<compile_context>
chip_gen: v5e
topology: v5e:2x2
jax: 0.10.0
libtpu: 0.0.40
codegen_flags: <defaults>
</compile_context>

<pallas_src>
import numpy as np
import jax
import jax.numpy as jnp
from jax.experimental import pallas as pl
from jax.experimental.pallas import tpu as pltpu


LPAD = 8  # column offset of the intermediate's interior inside the hp scratch (sublane-aligned)


def _round_up(n, m):
    return -(-n // m) * m


def _pick_chunk_rows(W, C, nrows):
    """Rows per matmul chunk: M = rows*W >= ~512 to amortize MXU pipeline fill, patch temp
    kept ~<= 2 MiB of VMEM, and at most ~32 unrolled chunks (trace/compile time)."""
    Kl = _round_up(3 * C, 128)                      # lane-padded contraction depth
    Wl = _round_up(max(W, 1), 8)

    def patch_bytes(r):
        return (r + 2) * Wl * Kl * 4

    r = max(1, -(-512 // max(W, 1)))
    while r > 1 and patch_bytes(r) > (2 << 20):
        r -= 1
    r = max(r, -(-nrows // 32))                     # cap the number of unrolled chunks
    return max(1, min(r, nrows))


def _vmem_budget_bytes():
    """~0.8x of physical per-core VMEM (generation-aware); conservative 64 MiB fallback (v7x)."""
    cap = 64 * 1024 * 1024
    try:
        info = pltpu.get_tpu_info()
        c = getattr(info, "vmem_capacity_bytes", None)
        if c:
            cap = int(c)
    except Exception:
        pass
    return int(cap * 0.8)


def _pick_tile_h(H, W, C, w_itemsize, budget):
    """Largest tile height whose per-step VMEM (incl. double-buffered weights) fits the budget."""
    Cl = _round_up(C, 128)                          # lane-padded channel footprint in VMEM
    Kl = _round_up(3 * C, 128)
    Wi = _round_up(W + 2, 8)                        # haloed input columns
    Ws = _round_up(W + LPAD + 1, 8)                 # hp scratch columns
    Wo = _round_up(W, 8)

    # VMEM-resident weights/biases; assume double-buffered by the pipeline.
    wbytes = 2 * (2 * 3 * _round_up(3 * C, 8) * Cl * w_itemsize + 2 * 8 * Cl * 4)
    avail = budget - wbytes - (2 << 20)             # slack for compiler-internal scratch

    best = 1
    for th in range(1, H + 1):
        ch = _pick_chunk_rows(W, C, th + 2)
        use = (2 * (th + 4) * Wi * Cl * 4           # haloed input slab, double-buffered
               + 2 * th * Wo * Cl * 4               # output tile, double-buffered
               + (th + 2) * Ws * Cl * 4             # hp scratch (f32 intermediate)
               + (ch + 2) * Wo * Kl * (4 + w_itemsize)   # per-chunk patch (f32 src + matmul copy)
               + 3 * ch * Wo * Cl * 4)              # h / acc chunk temporaries
        if use <= avail:
            best = th
        else:
            break
    return best


def _conv_rows(slab, n, col0, w_ref, bias_row, W, C):
    """3x3 'valid' conv producing n output rows from an already W-padded slab.

    slab : (n+2, >= col0+W+2, C) f32 value; col0 = column index of padded column -1.
    w_ref: (3, 3*C, C) weights, HWIO reshaped so K = (kx, cin); dtype sets the matmul dtype.
    bias_row: (1, C) f32.  Returns (n, W, C) f32 (accumulation always f32).
    """
    slab = slab.astype(w_ref.dtype)                 # bf16 operands if enabled
    # dx-tap fusion, hoisted out of the dy loop: ONE lane-axis concat per chunk.
    patch = jnp.concatenate(
        [slab[:, col0:col0 + W, :],
         slab[:, col0 + 1:col0 + 1 + W, :],
         slab[:, col0 + 2:col0 + 2 + W, :]], axis=-1)            # (n+2, W, 3C)
    # Bias folded into the accumulator init.
    acc = jnp.broadcast_to(bias_row, (n * W, C))
    for dy in range(3):
        acc = acc + jnp.dot(patch[dy:dy + n].reshape(n * W, 3 * C), w_ref[dy],
                            preferred_element_type=jnp.float32)
    return acc.reshape(n, W, C)


def resblock_kernel(xs_ref, w1_ref, b1_ref, w2_ref, b2_ref, o_ref, hp_ref):
    # xs_ref: (1, TH+4, W+2, C)  W-reflection-padded slab covering H-padded rows
    #         start-1 .. start+TH+2 (ends clamped; clamped rows only feed halo rows that are
    #         overwritten below).
    # w*_ref: (3, 3*C, C);  b*_ref: (1, C) f32
    # o_ref : (1, TH, W, C)
    # hp_ref: VMEM scratch (TH+2, W+LPAD+1, C) f32 -- reflection-padded intermediate;
    #         interior lives at columns LPAD..LPAD+W-1 (sublane-aligned bulk store),
    #         reflected columns at LPAD-1 and LPAD+W.
    TH, W, C = o_ref.shape[1], o_ref.shape[2], o_ref.shape[3]

    b1 = b1_ref[...].astype(jnp.float32)
    b2 = b2_ref[...].astype(jnp.float32)

    # ---- conv1 (+ LeakyReLU 0.2) over the TH+2 extended rows, chunked over rows ----
    n1 = TH + 2
    ch1 = _pick_chunk_rows(W, C, n1)
    for r0 in range(0, n1, ch1):
        n = min(ch1, n1 - r0)
        slab = xs_ref[0, r0:r0 + n + 2]                            # (n+2, W+2, C)
        h = _conv_rows(slab, n, 0, w1_ref, b1, W, C)
        h = jnp.where(h > 0, h, 0.2 * h)
        hp_ref[r0:r0 + n, LPAD:LPAD + W, :] = h                    # aligned interior store
        hp_ref[r0:r0 + n, LPAD - 1:LPAD, :] = h[:, 1:2, :]         # col -1 <- col 1
        hp_ref[r0:r0 + n, LPAD + W:LPAD + W + 1, :] = h[:, W - 2:W - 1, :]  # col W <- col W-2

    # ---- fix the intermediate's H-reflection rows at the true image top/bottom ----
    t = pl.program_id(1)

    @pl.when(t == 0)
    def _():                                                       # image top: h[-1] -> h[1]
        hp_ref[0:1] = hp_ref[2:3]

    @pl.when(t == pl.num_programs(1) - 1)
    def _():                                                       # image bottom: h[H] -> h[H-2]
        hp_ref[TH + 1:TH + 2] = hp_ref[TH - 1:TH]

    # ---- conv2 + residual over the TH output rows of this tile, chunked ----
    ch2 = _pick_chunk_rows(W, C, TH)
    for r0 in range(0, TH, ch2):
        n = min(ch2, TH - r0)
        slab = hp_ref[r0:r0 + n + 2]                               # (n+2, W+LPAD+1, C)
        h2 = _conv_rows(slab, n, LPAD - 1, w2_ref, b2, W, C)
        res = xs_ref[0, r0 + 2:r0 + n + 2, 1:W + 1, :].astype(jnp.float32)
        o_ref[0, r0:r0 + n] = (h2 + res).astype(o_ref.dtype)


def residual_block(x_nchw, w1, b1, w2, b2, tile_h=None, matmul_dtype=jnp.bfloat16):
    """ResidualBlock forward. x_nchw: (B, C, H, W) f32. w*: (3,3,C,C) HWIO, b*: (C,).

    matmul_dtype=jnp.bfloat16 (default) runs the MXU in bf16 with f32 accumulation
    (validated to ~1e-2 of the fp32 forward); pass jnp.float32 for strict fp32 matmuls.
    """
    x = jnp.transpose(x_nchw, (0, 2, 3, 1))                        # -> NHWC
    B, H, W, C = x.shape
    assert H >= 2 and W >= 2, "ReflectionPad2d(1) requires H >= 2 and W >= 2"

    budget = _vmem_budget_bytes()
    w_itemsize = jnp.dtype(matmul_dtype).itemsize

    if tile_h is not None:
        TH = int(max(1, min(tile_h, H)))
    else:
        th_max = _pick_tile_h(H, W, C, w_itemsize, budget)
        n_tiles = -(-H // th_max)
        if B == 1 and n_tiles == 1 and H >= 16:
            n_tiles = 2                                            # keep both TCs busy (v7x)
        TH = -(-H // n_tiles)
    nT = -(-H // TH)                                               # last tile may overlap

    # ---- wrapper glue (plain JAX): W reflect pad, per-tile haloed H slabs -------------
    # NOTE: channels are NOT zero-padded in HBM (memory-bound for small C).
    xw = jnp.pad(x, ((0, 0), (0, 0), (1, 1), (0, 0)), mode='reflect')   # (B, H, W+2, C)

    # H-reflection-padded row i maps to image row: 0 -> 1, H+1 -> H-2, else i-1.
    # Tile t covers image rows start..start+TH-1, start = min(t*TH, H-TH); it needs padded
    # rows start-1 .. start+TH+2 (ends clamped; clamped rows only feed halo rows that the
    # kernel overwrites via pl.when).
    starts = np.minimum(np.arange(nT) * TH, H - TH)
    xp_rows = np.clip(starts[:, None] - 1 + np.arange(TH + 4)[None, :], 0, H + 1)
    img_rows = np.where(xp_rows == 0, 1,
                        np.where(xp_rows == H + 1, H - 2, xp_rows - 1)).reshape(-1)
    xs = jnp.take(xw, jnp.asarray(img_rows, dtype=jnp.int32), axis=1)
    xs = xs.reshape(B * nT, TH + 4, W + 2, C)

    # Weights: HWIO (3,3,C,C) -> (3, 3*C, C) with K ordered as (kx, cin); matmul dtype cast.
    def prep_w(w):
        return jnp.asarray(w, jnp.float32).reshape(3, 3 * C, C).astype(matmul_dtype)

    def prep_b(b):
        return jnp.asarray(b, jnp.float32).reshape(1, C)

    w1p, w2p, b1p, b2p = prep_w(w1), prep_w(w2), prep_b(b1), prep_b(b2)

    flops = int(2 * 2 * 9 * C * C * B * nT * TH * W)
    bytes_accessed = int(4 * xs.size + 4 * B * nT * TH * W * C
                         + 2 * w1p.size * w_itemsize + 2 * 4 * C)

    out = pl.pallas_call(
        resblock_kernel,
        out_shape=jax.ShapeDtypeStruct((B * nT, TH, W, C), x.dtype),
        grid=(B, nT),
        in_specs=[
            pl.BlockSpec((1, TH + 4, W + 2, C), lambda b, t: (b * nT + t, 0, 0, 0)),
            # Constant index maps -> weights/biases fetched once, VMEM-resident.
            pl.BlockSpec((3, 3 * C, C), lambda b, t: (0, 0, 0)),
            pl.BlockSpec((1, C), lambda b, t: (0, 0)),
            pl.BlockSpec((3, 3 * C, C), lambda b, t: (0, 0, 0)),
            pl.BlockSpec((1, C), lambda b, t: (0, 0)),
        ],
        out_specs=pl.BlockSpec((1, TH, W, C), lambda b, t: (b * nT + t, 0, 0, 0)),
        scratch_shapes=[pltpu.VMEM((TH + 2, W + LPAD + 1, C), jnp.float32)],
        compiler_params=pltpu.CompilerParams(
            dimension_semantics=("parallel", "parallel"),
            vmem_limit_bytes=budget),
        cost_estimate=pl.CostEstimate(flops=flops, transcendentals=0,
                                      bytes_accessed=bytes_accessed),
    )(xs, w1p, b1p, w2p, b2p)

    # Reassemble rows (handles the overlapping last tile when TH does not divide H).
    out = out.reshape(B, nT, TH, W, C)
    if nT * TH == H:
        out = out.reshape(B, H, W, C)
    else:
        head = out[:, :nT - 1].reshape(B, (nT - 1) * TH, W, C)
        tail_rows = H - (nT - 1) * TH
        tail = out[:, nT - 1, TH - tail_rows:, :, :]
        out = jnp.concatenate([head, tail], axis=1)
    return jnp.transpose(out, (0, 3, 1, 2))                        # -> NCHW


def _reference(x_nchw, w1, b1, w2, b2):
    """Pure-JAX reference matching the PyTorch forward (norm=None path)."""
    def conv(inp_nhwc, w, b):
        xp = jnp.pad(inp_nhwc, ((0, 0), (1, 1), (1, 1), (0, 0)), mode='reflect')
        y = jax.lax.conv_general_dilated(
            xp, w, window_strides=(1, 1), padding='VALID',
            dimension_numbers=('NHWC', 'HWIO', 'NHWC'))
        return y + b
    xn = jnp.transpose(x_nchw, (0, 2, 3, 1))
    h = conv(xn, w1, b1)
    h = jnp.where(h > 0, h, 0.2 * h)
    o = conv(h, w2, b2) + xn
    return jnp.transpose(o, (0, 3, 1, 2))


if __name__ == "__main__":
    B, C, H, W = 2, 4, 16, 16
    key = jax.random.PRNGKey(0)
    kx, kw1, kb1, kw2, kb2 = jax.random.split(key, 5)

    x = jax.random.normal(kx, (B, C, H, W), dtype=jnp.float32)
    # Deterministic synthetic parameters (Conv2d(channels, channels, 3) shapes, HWIO layout).
    w1 = 0.1 * jax.random.normal(kw1, (3, 3, C, C), dtype=jnp.float32)
    b1 = 0.05 * jax.random.normal(kb1, (C,), dtype=jnp.float32)
    w2 = 0.1 * jax.random.normal(kw2, (3, 3, C, C), dtype=jnp.float32)
    b2 = 0.05 * jax.random.normal(kb2, (C,), dtype=jnp.float32)

    ref = _reference(x, w1, b1, w2, b2)

    # fp32-matmul path, multi-tile (exercises halo / seam handling), strict tolerance.
    out_f32 = residual_block(x, w1, b1, w2, b2, tile_h=8, matmul_dtype=jnp.float32)
    jax.block_until_ready(out_f32)
    assert out_f32.shape == (B, C, H, W)
    assert jnp.allclose(out_f32, ref, atol=1e-4, rtol=1e-4)

    # Non-divisor tile height -> exercises the overlapping last tile path.
    out_ov = residual_block(x, w1, b1, w2, b2, tile_h=6, matmul_dtype=jnp.float32)
    jax.block_until_ready(out_ov)
    assert jnp.allclose(out_ov, ref, atol=1e-4, rtol=1e-4)

    # Default path: auto tile height + bf16 matmul operands (f32 accumulate), loose tolerance.
    out_bf16 = residual_block(x, w1, b1, w2, b2)
    jax.block_until_ready(out_bf16)
    assert out_bf16.shape == (B, C, H, W)
    assert jnp.allclose(out_bf16, ref, atol=2e-2, rtol=2e-2)

    print("KERNEL_OK")
</pallas_src>

<mosaic_0001>
module attributes {stable_mosaic.version = 11 : i64} {
  func.func @resblock_kernel(%arg0: i32, %arg1: i32, %arg2: memref<1x12x18x4xf32, #tpu.memory_space<vmem>>, %arg3: memref<3x12x4xf32, #tpu.memory_space<vmem>>, %arg4: memref<1x4xf32, #tpu.memory_space<vmem>>, %arg5: memref<3x12x4xf32, #tpu.memory_space<vmem>>, %arg6: memref<1x4xf32, #tpu.memory_space<vmem>>, %arg7: memref<1x8x16x4xf32, #tpu.memory_space<vmem>>, %arg8: memref<10x25x4xf32, #tpu.memory_space<vmem>>) attributes {dimension_semantics = [#tpu.dimension_semantics<parallel>, #tpu.dimension_semantics<parallel>], iteration_bounds = array<i64: 2, 2>, scalar_prefetch = 0 : i64, scratch_operands = 1 : i64, tpu.core_type = #tpu.core_type<tc>, window_params = [{transform_indices = @transform_0, window_bounds = array<i64: 1, 12, 18, 4>}, {pipeline_mode = #tpu.pipeline_mode<synchronous>, transform_indices = @transform_1, window_bounds = array<i64: 3, 12, 4>}, {pipeline_mode = #tpu.pipeline_mode<synchronous>, transform_indices = @transform_2, window_bounds = array<i64: 1, 4>}, {pipeline_mode = #tpu.pipeline_mode<synchronous>, transform_indices = @transform_3, window_bounds = array<i64: 3, 12, 4>}, {pipeline_mode = #tpu.pipeline_mode<synchronous>, transform_indices = @transform_4, window_bounds = array<i64: 1, 4>}, {transform_indices = @transform_5, window_bounds = array<i64: 1, 8, 16, 4>}]} {
    %c0 = arith.constant 0 : index
    %c0_0 = arith.constant 0 : index
    %0 = vector.load %arg4[%c0, %c0_0] : memref<1x4xf32, #tpu.memory_space<vmem>>, vector<1x4xf32>
    %c0_1 = arith.constant 0 : index
    %c0_2 = arith.constant 0 : index
    %1 = vector.load %arg6[%c0_1, %c0_2] : memref<1x4xf32, #tpu.memory_space<vmem>>, vector<1x4xf32>
    %c0_3 = arith.constant 0 : index
    %c0_4 = arith.constant 0 : index
    %c0_5 = arith.constant 0 : index
    %c0_6 = arith.constant 0 : index
    %2 = vector.load %arg2[%c0_3, %c0_4, %c0_5, %c0_6] : memref<1x12x18x4xf32, #tpu.memory_space<vmem>>, vector<1x12x18x4xf32>
    %3 = vector.shape_cast %2 : vector<1x12x18x4xf32> to vector<12x18x4xf32>
    %4 = vector.extract_strided_slice %3 {offsets = [0, 0, 0], sizes = [12, 16, 4], strides = [1, 1, 1]} : vector<12x18x4xf32> to vector<12x16x4xf32>
    %5 = vector.extract_strided_slice %3 {offsets = [0, 1, 0], sizes = [12, 16, 4], strides = [1, 1, 1]} : vector<12x18x4xf32> to vector<12x16x4xf32>
    %6 = vector.extract_strided_slice %3 {offsets = [0, 2, 0], sizes = [12, 16, 4], strides = [1, 1, 1]} : vector<12x18x4xf32> to vector<12x16x4xf32>
    %7 = tpu.concatenate %4, %5, %6 in 2 : vector<12x16x4xf32>, vector<12x16x4xf32>, vector<12x16x4xf32> -> vector<12x16x12xf32>
    %8 = vector.shape_cast %0 : vector<1x4xf32> to vector<1x4xf32>
    %9 = vector.broadcast %8 : vector<1x4xf32> to vector<160x4xf32>
    %10 = vector.extract_strided_slice %7 {offsets = [0, 0, 0], sizes = [10, 16, 12], strides = [1, 1, 1]} : vector<12x16x12xf32> to vector<10x16x12xf32>
    %11 = vector.shape_cast %10 : vector<10x16x12xf32> to vector<160x12xf32>
    %c0_7 = arith.constant 0 : index
    %c0_8 = arith.constant 0 : index
    %c0_9 = arith.constant 0 : index
    %12 = vector.load %arg3[%c0_7, %c0_8, %c0_9] : memref<3x12x4xf32, #tpu.memory_space<vmem>>, vector<1x12x4xf32>
    %13 = vector.shape_cast %12 : vector<1x12x4xf32> to vector<12x4xf32>
    %cst = arith.constant dense<0.000000e+00> : vector<160x4xf32>
    %14 = tpu.matmul %11, %13, %cst {dimension_numbers = #tpu.dot_dimension_numbers<[1], [0], [0], [1], [0, 0, 1, 1], [], []>} : vector<160x12xf32>, vector<12x4xf32>, vector<160x4xf32> -> vector<160x4xf32>
    %15 = arith.addf %9, %14 : vector<160x4xf32>
    %16 = vector.extract_strided_slice %7 {offsets = [1, 0, 0], sizes = [10, 16, 12], strides = [1, 1, 1]} : vector<12x16x12xf32> to vector<10x16x12xf32>
    %17 = vector.shape_cast %16 : vector<10x16x12xf32> to vector<160x12xf32>
    %c1 = arith.constant 1 : index
    %c0_10 = arith.constant 0 : index
    %c0_11 = arith.constant 0 : index
    %18 = vector.load %arg3[%c1, %c0_10, %c0_11] : memref<3x12x4xf32, #tpu.memory_space<vmem>>, vector<1x12x4xf32>
    %19 = vector.shape_cast %18 : vector<1x12x4xf32> to vector<12x4xf32>
    %cst_12 = arith.constant dense<0.000000e+00> : vector<160x4xf32>
    %20 = tpu.matmul %17, %19, %cst_12 {dimension_numbers = #tpu.dot_dimension_numbers<[1], [0], [0], [1], [0, 0, 1, 1], [], []>} : vector<160x12xf32>, vector<12x4xf32>, vector<160x4xf32> -> vector<160x4xf32>
    %21 = arith.addf %15, %20 : vector<160x4xf32>
    %22 = vector.extract_strided_slice %7 {offsets = [2, 0, 0], sizes = [10, 16, 12], strides = [1, 1, 1]} : vector<12x16x12xf32> to vector<10x16x12xf32>
    %23 = vector.shape_cast %22 : vector<10x16x12xf32> to vector<160x12xf32>
    %c2 = arith.constant 2 : index
    %c0_13 = arith.constant 0 : index
    %c0_14 = arith.constant 0 : index
    %24 = vector.load %arg3[%c2, %c0_13, %c0_14] : memref<3x12x4xf32, #tpu.memory_space<vmem>>, vector<1x12x4xf32>
    %25 = vector.shape_cast %24 : vector<1x12x4xf32> to vector<12x4xf32>
    %cst_15 = arith.constant dense<0.000000e+00> : vector<160x4xf32>
    %26 = tpu.matmul %23, %25, %cst_15 {dimension_numbers = #tpu.dot_dimension_numbers<[1], [0], [0], [1], [0, 0, 1, 1], [], []>} : vector<160x12xf32>, vector<12x4xf32>, vector<160x4xf32> -> vector<160x4xf32>
    %27 = arith.addf %21, %26 : vector<160x4xf32>
    %28 = vector.shape_cast %27 : vector<160x4xf32> to vector<10x16x4xf32>
    %cst_16 = arith.constant 0.000000e+00 : f32
    %29 = vector.broadcast %cst_16 : f32 to vector<10x16x4xf32>
    %30 = arith.cmpf ogt, %28, %29 : vector<10x16x4xf32>
    %cst_17 = arith.constant 2.000000e-01 : f32
    %31 = vector.broadcast %cst_17 : f32 to vector<10x16x4xf32>
    %32 = arith.mulf %31, %28 : vector<10x16x4xf32>
    %33 = arith.select %30, %28, %32 : vector<10x16x4xi1>, vector<10x16x4xf32>
    %c0_18 = arith.constant 0 : index
    %c8 = arith.constant 8 : index
    %c0_19 = arith.constant 0 : index
    %34 = vector.load %arg8[%c0_18, %c8, %c0_19] : memref<10x25x4xf32, #tpu.memory_space<vmem>>, vector<10x16x4xf32>
    tpu.vector_store %arg8[%c0_18, %c8, %c0_19], %33 {strides = array<i32>} : memref<10x25x4xf32, #tpu.memory_space<vmem>>, vector<10x16x4xf32>,
    %35 = vector.extract_strided_slice %33 {offsets = [0, 1, 0], sizes = [10, 1, 4], strides = [1, 1, 1]} : vector<10x16x4xf32> to vector<10x1x4xf32>
    %c0_20 = arith.constant 0 : index
    %c7 = arith.constant 7 : index
    %c0_21 = arith.constant 0 : index
    %36 = vector.load %arg8[%c0_20, %c7, %c0_21] : memref<10x25x4xf32, #tpu.memory_space<vmem>>, vector<10x1x4xf32>
    tpu.vector_store %arg8[%c0_20, %c7, %c0_21], %35 {strides = array<i32>} : memref<10x25x4xf32, #tpu.memory_space<vmem>>, vector<10x1x4xf32>,
    %37 = vector.extract_strided_slice %33 {offsets = [0, 14, 0], sizes = [10, 1, 4], strides = [1, 1, 1]} : vector<10x16x4xf32> to vector<10x1x4xf32>
    %c0_22 = arith.constant 0 : index
    %c24 = arith.constant 24 : index
    %c0_23 = arith.constant 0 : index
    %38 = vector.load %arg8[%c0_22, %c24, %c0_23] : memref<10x25x4xf32, #tpu.memory_space<vmem>>, vector<10x1x4xf32>
    tpu.vector_store %arg8[%c0_22, %c24, %c0_23], %37 {strides = array<i32>} : memref<10x25x4xf32, #tpu.memory_space<vmem>>, vector<10x1x4xf32>,
    %c0_i32 = arith.constant 0 : i32
    %39 = arith.cmpi eq, %arg1, %c0_i32 : i32
    %40 = arith.extui %39 : i1 to i32
    %c0_i32_24 = arith.constant 0 : i32
    %41 = arith.cmpi ne, %40, %c0_i32_24 : i32
    scf.if %41 {
      %c2_49 = arith.constant 2 : index
      %c0_50 = arith.constant 0 : index
      %c0_51 = arith.constant 0 : index
      %77 = vector.load %arg8[%c2_49, %c0_50, %c0_51] : memref<10x25x4xf32, #tpu.memory_space<vmem>>, vector<1x25x4xf32>
      %c0_52 = arith.constant 0 : index
      %c0_53 = arith.constant 0 : index
      %c0_54 = arith.constant 0 : index
      %78 = vector.load %arg8[%c0_52, %c0_53, %c0_54] : memref<10x25x4xf32, #tpu.memory_space<vmem>>, vector<1x25x4xf32>
      tpu.vector_store %arg8[%c0_52, %c0_53, %c0_54], %77 {strides = array<i32>} : memref<10x25x4xf32, #tpu.memory_space<vmem>>, vector<1x25x4xf32>,
    } else {
    }
    %c1_i32 = arith.constant 1 : i32
    %42 = arith.cmpi eq, %arg1, %c1_i32 : i32
    %43 = arith.extui %42 : i1 to i32
    %c0_i32_25 = arith.constant 0 : i32
    %44 = arith.cmpi ne, %43, %c0_i32_25 : i32
    scf.if %44 {
      %c7_49 = arith.constant 7 : index
      %c0_50 = arith.constant 0 : index
      %c0_51 = arith.constant 0 : index
      %77 = vector.load %arg8[%c7_49, %c0_50, %c0_51] : memref<10x25x4xf32, #tpu.memory_space<vmem>>, vector<1x25x4xf32>
      %c9 = arith.constant 9 : index
      %c0_52 = arith.constant 0 : index
      %c0_53 = arith.constant 0 : index
      %78 = vector.load %arg8[%c9, %c0_52, %c0_53] : memref<10x25x4xf32, #tpu.memory_space<vmem>>, vector<1x25x4xf32>
      tpu.vector_store %arg8[%c9, %c0_52, %c0_53], %77 {strides = array<i32>} : memref<10x25x4xf32, #tpu.memory_space<vmem>>, vector<1x25x4xf32>,
    } else {
    }
    %c0_26 = arith.constant 0 : index
    %c0_27 = arith.constant 0 : index
    %c0_28 = arith.constant 0 : index
    %45 = vector.load %arg8[%c0_26, %c0_27, %c0_28] : memref<10x25x4xf32, #tpu.memory_space<vmem>>, vector<10x25x4xf32>
    %46 = vector.extract_strided_slice %45 {offsets = [0, 7, 0], sizes = [10, 16, 4], strides = [1, 1, 1]} : vector<10x25x4xf32> to vector<10x16x4xf32>
    %47 = vector.extract_strided_slice %45 {offsets = [0, 8, 0], sizes = [10, 16, 4], strides = [1, 1, 1]} : vector<10x25x4xf32> to vector<10x16x4xf32>
    %48 = vector.extract_strided_slice %45 {offsets = [0, 9, 0], sizes = [10, 16, 4], strides = [1, 1, 1]} : vector<10x25x4xf32> to vector<10x16x4xf32>
    %49 = tpu.concatenate %46, %47, %48 in 2 : vector<10x16x4xf32>, vector<10x16x4xf32>, vector<10x16x4xf32> -> vector<10x16x12xf32>
    %50 = vector.shape_cast %1 : vector<1x4xf32> to vector<1x4xf32>
    %51 = vector.broadcast %50 : vector<1x4xf32> to vector<128x4xf32>
    %52 = vector.extract_strided_slice %49 {offsets = [0, 0, 0], sizes = [8, 16, 12], strides = [1, 1, 1]} : vector<10x16x12xf32> to vector<8x16x12xf32>
    %53 = vector.shape_cast %52 : vector<8x16x12xf32> to vector<128x12xf32>
    %c0_29 = arith.constant 0 : index
    %c0_30 = arith.constant 0 : index
    %c0_31 = arith.constant 0 : index
    %54 = vector.load %arg5[%c0_29, %c0_30, %c0_31] : memref<3x12x4xf32, #tpu.memory_space<vmem>>, vector<1x12x4xf32>
    %55 = vector.shape_cast %54 : vector<1x12x4xf32> to vector<12x4xf32>
    %cst_32 = arith.constant dense<0.000000e+00> : vector<128x4xf32>
    %56 = tpu.matmul %53, %55, %cst_32 {dimension_numbers = #tpu.dot_dimension_numbers<[1], [0], [0], [1], [0, 0, 1, 1], [], []>} : vector<128x12xf32>, vector<12x4xf32>, vector<128x4xf32> -> vector<128x4xf32>
    %57 = arith.addf %51, %56 : vector<128x4xf32>
    %58 = vector.extract_strided_slice %49 {offsets = [1, 0, 0], sizes = [8, 16, 12], strides = [1, 1, 1]} : vector<10x16x12xf32> to vector<8x16x12xf32>
    %59 = vector.shape_cast %58 : vector<8x16x12xf32> to vector<128x12xf32>
    %c1_33 = arith.constant 1 : index
    %c0_34 = arith.constant 0 : index
    %c0_35 = arith.constant 0 : index
    %60 = vector.load %arg5[%c1_33, %c0_34, %c0_35] : memref<3x12x4xf32, #tpu.memory_space<vmem>>, vector<1x12x4xf32>
    %61 = vector.shape_cast %60 : vector<1x12x4xf32> to vector<12x4xf32>
    %cst_36 = arith.constant dense<0.000000e+00> : vector<128x4xf32>
    %62 = tpu.matmul %59, %61, %cst_36 {dimension_numbers = #tpu.dot_dimension_numbers<[1], [0], [0], [1], [0, 0, 1, 1], [], []>} : vector<128x12xf32>, vector<12x4xf32>, vector<128x4xf32> -> vector<128x4xf32>
    %63 = arith.addf %57, %62 : vector<128x4xf32>
    %64 = vector.extract_strided_slice %49 {offsets = [2, 0, 0], sizes = [8, 16, 12], strides = [1, 1, 1]} : vector<10x16x12xf32> to vector<8x16x12xf32>
    %65 = vector.shape_cast %64 : vector<8x16x12xf32> to vector<128x12xf32>
    %c2_37 = arith.constant 2 : index
    %c0_38 = arith.constant 0 : index
    %c0_39 = arith.constant 0 : index
    %66 = vector.load %arg5[%c2_37, %c0_38, %c0_39] : memref<3x12x4xf32, #tpu.memory_space<vmem>>, vector<1x12x4xf32>
    %67 = vector.shape_cast %66 : vector<1x12x4xf32> to vector<12x4xf32>
    %cst_40 = arith.constant dense<0.000000e+00> : vector<128x4xf32>
    %68 = tpu.matmul %65, %67, %cst_40 {dimension_numbers = #tpu.dot_dimension_numbers<[1], [0], [0], [1], [0, 0, 1, 1], [], []>} : vector<128x12xf32>, vector<12x4xf32>, vector<128x4xf32> -> vector<128x4xf32>
    %69 = arith.addf %63, %68 : vector<128x4xf32>
    %70 = vector.shape_cast %69 : vector<128x4xf32> to vector<8x16x4xf32>
    %c0_41 = arith.constant 0 : index
    %c2_42 = arith.constant 2 : index
    %c1_43 = arith.constant 1 : index
    %c0_44 = arith.constant 0 : index
    %71 = vector.load %arg2[%c0_41, %c2_42, %c1_43, %c0_44] : memref<1x12x18x4xf32, #tpu.memory_space<vmem>>, vector<1x8x16x4xf32>
    %72 = vector.shape_cast %71 : vector<1x8x16x4xf32> to vector<8x16x4xf32>
    %73 = arith.addf %70, %72 : vector<8x16x4xf32>
    %c0_45 = arith.constant 0 : index
    %c0_46 = arith.constant 0 : index
    %c0_47 = arith.constant 0 : index
    %c0_48 = arith.constant 0 : index
    %74 = vector.load %arg7[%c0_45, %c0_46, %c0_47, %c0_48] : memref<1x8x16x4xf32, #tpu.memory_space<vmem>>, vector<1x8x16x4xf32>
    %75 = vector.shape_cast %74 : vector<1x8x16x4xf32> to vector<8x16x4xf32>
    %76 = vector.shape_cast %73 : vector<8x16x4xf32> to vector<1x8x16x4xf32>
    tpu.vector_store %arg7[%c0_45, %c0_46, %c0_47, %c0_48], %76 {strides = array<i32>} : memref<1x8x16x4xf32, #tpu.memory_space<vmem>>, vector<1x8x16x4xf32>,
    return
  }
  func.func @transform_0(%arg0: i32, %arg1: i32) -> (i32, i32, i32, i32) {
    %c2_i32 = arith.constant 2 : i32
    %0 = arith.muli %arg0, %c2_i32 : i32
    %1 = arith.addi %0, %arg1 : i32
    %c0_i32 = arith.constant 0 : i32
    %c0_i32_0 = arith.constant 0 : i32
    %c0_i32_1 = arith.constant 0 : i32
    %c0_i32_2 = arith.constant 0 : i32
    return %1, %c0_i32, %c0_i32_0, %c0_i32_1 : i32, i32, i32, i32
  }
  func.func @transform_1(%arg0: i32, %arg1: i32) -> (i32, i32, i32) {
    %c0_i32 = arith.constant 0 : i32
    %c0_i32_0 = arith.constant 0 : i32
    %c0_i32_1 = arith.constant 0 : i32
    %c0_i32_2 = arith.constant 0 : i32
    return %c0_i32, %c0_i32_0, %c0_i32_1 : i32, i32, i32
  }
  func.func @transform_2(%arg0: i32, %arg1: i32) -> (i32, i32) {
    %c0_i32 = arith.constant 0 : i32
    %c0_i32_0 = arith.constant 0 : i32
    %c0_i32_1 = arith.constant 0 : i32
    return %c0_i32, %c0_i32_0 : i32, i32
  }
  func.func @transform_3(%arg0: i32, %arg1: i32) -> (i32, i32, i32) {
    %c0_i32 = arith.constant 0 : i32
    %c0_i32_0 = arith.constant 0 : i32
    %c0_i32_1 = arith.constant 0 : i32
    %c0_i32_2 = arith.constant 0 : i32
    return %c0_i32, %c0_i32_0, %c0_i32_1 : i32, i32, i32
  }
  func.func @transform_4(%arg0: i32, %arg1: i32) -> (i32, i32) {
    %c0_i32 = arith.constant 0 : i32
    %c0_i32_0 = arith.constant 0 : i32
    %c0_i32_1 = arith.constant 0 : i32
    return %c0_i32, %c0_i32_0 : i32, i32
  }
  func.func @transform_5(%arg0: i32, %arg1: i32) -> (i32, i32, i32, i32) {
    %c2_i32 = arith.constant 2 : i32
    %0 = arith.muli %arg0, %c2_i32 : i32
    %1 = arith.addi %0, %arg1 : i32
    %c0_i32 = arith.constant 0 : i32
    %c0_i32_0 = arith.constant 0 : i32
    %c0_i32_1 = arith.constant 0 : i32
    %c0_i32_2 = arith.constant 0 : i32
    return %1, %c0_i32, %c0_i32_0, %c0_i32_1 : i32, i32, i32, i32
  }
}

</mosaic_0001>

<bundles_post_ra>
// kernel: tpu_custom_call.1
= control target key start
LH: loop header
LB: loop body
LE: loop exit
PB: predicated region body
PF: predicated region fallthrough
CT: control target
= control target key end

     0   :  { %s2342_s18 = smov 0   ;;  %s2344_s19 = smov 0   ;;  %s3480_s0 = inlined_call_operand.vmem [shape: f32[4,12,18,4], index: 0, kind: input, shape index: {}]   ;;  %s3481_s1 = inlined_call_operand.vmem [shape: f32[3,12,4], index: 1, kind: input, shape index: {}]   ;;  %s3482_s2 = inlined_call_operand.vmem [shape: f32[1,4], index: 2, kind: input, shape index: {}]   ;;  %s3483_s3 = inlined_call_operand.vmem [shape: f32[3,12,4], index: 3, kind: input, shape index: {}]   ;;  %s3484_s4 = inlined_call_operand.vmem [shape: f32[1,4], index: 4, kind: input, shape index: {}]   ;;  %s3485_s5 = inlined_call_operand.vmem [shape: f32[4,8,16,4], index: 5, kind: output, shape index: {}]  }
   0x1   :  { %s2346_s20 = smov 0   ;;  %s2348_s21 = smov 0  }
   0x2   :  { %s2350_s22 = smov 0  }
   0x3 LB: > { %s24_s23 = sadd.s32 1, %s2300_s20  ;;  %s27_s24 = sadd.s32 1, %s2304_s21  ;;  %s2308_s22 = sphi %s2350_s22, %s15_s22   ;;  %s2304_s21 = sphi %s2348_s21, %s3489_s21   ;;  %s2300_s20 = sphi %s2346_s20, %s3488_s20   ;;  %s2296_s19 = sphi %s2344_s19, %s3487_s19   ;;  %s2292_s18 = sphi %s2342_s18, %s3486_s18  }
   0x4   : > { %p25_p0 = scmp.ge.s32.totalorder %s24_s23, 2  ;;  %p2071_p1 = scmp.ge.s32.totalorder %s2308_s22, 1 }
   0x5   : > { %p211_p2 = scmp.lt.s32.totalorder %s2308_s22, 5 }
   0x6   : > { %s3491_s23 = smov (%p25_p0, %s24_s23), 0  ;;  %s3493_s24 = smov (!%p25_p0, %s27_s24), %s2304_s21 }
   0x7   : > { %p212_p3 = pnand %p2071_p1, %p211_p2  ;;  %p29_p4 = scmp.ge.s32.totalorder %s3493_s24, 2 }
   0x8   : > { %s2072_s25 = sshll.u32 (!%p212_p3), %s2296_s19, 1  ;;  %s2310_s10 = smov (!%p212_p3), 4  }
   0x9   : > { %s3495_s24 = smov (%p29_p4, %s3493_s24), 0  ;;  %215 = sbr.rel (%p212_p3) target bundleno = 985 (0x3d9), region = 40 }
   0xa   : > { %s244_s26 = sadd.s32 (!%p212_p3), %s2292_s18, %s2072_s25  ;;  %s2311_s11 = smov (!%p212_p3), 8  }
   0xb   : > { %p245_p5 = scmp.lt.s32.totalorder (!%p212_p3), %s244_s26, 3  ;;  %p2144_p6 = scmp.ne.s32.totalorder (!%p212_p3), %s2292_s18, 0 }
   0xe   : > { %s3497_s26 = smov (!%p245_p5, %s244_s26), 3  ;;  %vm335_vm0 = vcmask 1046528   ;;  %vm468_vm1 = vcmask 1045504   ;;  %vm717_vm2 = vcmask 1043456   ;;  %vm601_vm3 = vcmask 31744  }
   0xf   : > { %s2226_s27 = smul.u32 288, %s3497_s26  ;;  %s2219_s28 = sshll.u32 %s3497_s26, 7  ;;  %vm626_vm4 = vcmask 64512   ;;  %vm656_vm5 = vcmask 97280   ;;  %vm1116_vm7 = vcmask 25601   ;;  %vm1127_vm9 = vcmask 30726  }
  0x10   : > { %s2378_s6 = scalar_lea.vmem %s3485_s5, %s2219_s28 }
  0x11   : > { %s2383_s9 = scalar_lea.vmem %s3480_s0, %s2226_s27 }
  0x12   : > { %v2386_v0 = vld [vmem:[%s2383_s9 + $0x80] sm:$0xff]  ;;  %v280_v1 = vld [vmem:[%s2383_s9 + $0x88] sm:$0x3]  ;;  %v2390_v2 = vld [vmem:[%s2383_s9 + $0x90] sm:$0xff] }
  0x13   : > { %v362_v3 = vrot.slane %v2386_v0, 1  ;;  %v364_v4 = vrot.slane %v280_v1, 1  ;;  %v2394_v5 = vld [vmem:[%s2383_s9 + $0x98] sm:$0xff]  ;;  %v366_v6 = vrot.slane %v2390_v2, 1  ;;  %v283_v10 = vld [vmem:[%s2383_s9 + $0xa0] sm:$0x3] }
  0x14   : > { %v367_v7 = vrot.slane %v2394_v5, 1  ;;  %v495_v11 = vrot.slane %v2386_v0, 2  ;;  %v497_v12 = vrot.slane %v280_v1, 2  ;;  %v499_v13 = vrot.slane %v2390_v2, 2  ;;  %v2415_v19 = vld [vmem:[%s2383_s9 + $0xa8] sm:$0xff]  ;;  %v2418_v20 = vld [vmem:[%s2383_s9 + $0xb0] sm:$0xff] }
  0x15   : > { %v365_v8 = vsel %vm335_vm0, %v362_v3, %v364_v4  ;;  %v500_v14 = vrot.slane %v2394_v5, 2  ;;  %v369_v15 = vrot.slane %v283_v10, 1  ;;  %v502_v21 = vrot.slane %v283_v10, 2  ;;  %v286_v28 = vld [vmem:[%s2383_s9 + $0xb8] sm:$0x3]  ;;  %v2435_v32 = vld [vmem:[%s2383_s9 + $0xe0] sm:$0xff] }
  0x16   : > { %418 = vrot.lane.b32.xlu0 %v365_v8, %s2310_s10  ;;  %v368_v9 = vsel %vm335_vm0, %v366_v6, %v367_v7  ;;  %v498_v17 = vsel %vm468_vm1, %v495_v11, %v497_v12  ;;  %v371_v22 = vrot.slane %v2415_v19, 1  ;;  %v372_v23 = vrot.slane %v2418_v20, 1  ;;  %v2432_v31 = vld [vmem:[%s2383_s9 + $0xd8] sm:$0xff]  ;;  %v2446_v39 = vld [vmem:[%s2383_s9 + $0xc0] sm:$0xff]  ;;  %v2449_v40 = vld [vmem:[%s2383_s9 + $0xc8] sm:$0xff] }
  0x17   : > { %420 = vrot.lane.b32.xlu1 %v368_v9, %s2310_s10  ;;  %v370_v16 = vsel %vm335_vm0, %v367_v7, %v369_v15  ;;  %v501_v18 = vsel %vm468_vm1, %v499_v13, %v500_v14  ;;  %v504_v24 = vrot.slane %v2415_v19, 2  ;;  %v505_v25 = vrot.slane %v2418_v20, 2  ;;  %v292_v49 = vld [vmem:[%s2383_s9 + $0xe8] sm:$0x3]  ;;  %v289_v52 = vld [vmem:[%s2383_s9 + $0xd0] sm:$0x3] }
  0x18   : > { %422 = vrot.lane.b32.xlu2 %v370_v16, %s2310_s10  ;;  %v503_v26 = vsel %vm468_vm1, %v500_v14, %v502_v21  ;;  %v373_v27 = vsel %vm335_vm0, %v371_v22, %v372_v23  ;;  %v374_v30 = vrot.slane %v286_v28, 1  ;;  %v507_v33 = vrot.slane %v286_v28, 2  ;;  %v2472_v58 = vld [vmem:[%s2383_s9 + $0x30] sm:$0xff]  ;;  %v2475_v59 = vld [vmem:[%s2383_s9 + $0x38] sm:$0xff]  ;;  %v2491_v9 = vld [vmem:[%s2383_s9 + $0x20] sm:$0xff] }
  0x19   : > { %v506_v29 = vsel %vm468_vm1, %v504_v24, %v505_v25  ;;  %v381_v34 = vrot.slane %v2432_v31, 1  ;;  %v382_v35 = vrot.slane %v2435_v32, 1  ;;  %v514_v41 = vrot.slane %v2432_v31, 2  ;;  %v2486_v7 = vld [vmem:[%s2383_s9 + $0x18] sm:$0xff]  ;;  %v271_v12 = vld [vmem:[%s2383_s9 + $0x40] sm:$0x3] }
  0x1a   : > { %v375_v36 = vsel %vm335_vm0, %v372_v23, %v374_v30  ;;  %v508_v37 = vsel %vm468_vm1, %v505_v25, %v507_v33  ;;  %v515_v42 = vrot.slane %v2435_v32, 2  ;;  %v376_v43 = vrot.slane %v2446_v39, 1  ;;  %v268_v22 = vld [vmem:[%s2383_s9 + $0x28] sm:$0x3] }
  0x1b   : > { %v383_v38 = vsel %vm335_vm0, %v381_v34, %v382_v35  ;;  %v377_v44 = vrot.slane %v2449_v40, 1  ;;  %v509_v45 = vrot.slane %v2446_v39, 2  ;;  %v510_v46 = vrot.slane %v2449_v40, 2  ;;  %v2510_v28 = vld [vmem:[%s2383_s9 + $0x48] sm:$0xff]  ;;  %v274_v34 = vld [vmem:[%s2383_s9 + $0x58] sm:$0x3] }
  0x1c   : > { %v516_v47 = vsel %vm468_vm1, %v514_v41, %v515_v42  ;;  %v384_v51 = vrot.slane %v292_v49, 1  ;;  %v517_v53 = vrot.slane %v292_v49, 2  ;;  %v379_v54 = vrot.slane %v289_v52, 1 }
  0x1d   : > { %v378_v48 = vsel %vm335_vm0, %v376_v43, %v377_v44  ;;  %v511_v50 = vsel %vm468_vm1, %v509_v45, %v510_v46  ;;  %v512_v60 = vrot.slane %v289_v52, 2  ;;  %v346_v61 = vrot.slane %v2472_v58, 1  ;;  %v2532_v45 = vld [vmem:[%s2383_s9 + $0x68] sm:$0xff] }
  0x1e   : > { %551 = vrot.lane.b32.xlu0 %v498_v17, %s2311_s11  ;;  %v385_v55 = vsel %vm335_vm0, %v382_v35, %v384_v51  ;;  %v518_v56 = vsel %vm468_vm1, %v515_v42, %v517_v53  ;;  %v380_v57 = vsel %vm335_vm0, %v377_v44, %v379_v54  ;;  %v347_v62 = vrot.slane %v2475_v59, 1  ;;  %v2529_v44 = vld [vmem:[%s2383_s9 + $0x60] sm:$0xff]  ;;  %v277_v53 = vld [vmem:[%s2383_s9 + $0x70] sm:$0x3] }
  0x1f   : > { %553 = vrot.lane.b32.xlu1 %v501_v18, %s2311_s11  ;;  %v479_v63 = vrot.slane %v2472_v58, 2  ;;  %v480_v1 = vrot.slane %v2475_v59, 2  ;;  %v513_v4 = vsel %vm468_vm1, %v510_v46, %v512_v60  ;;  %v341_v10 = vrot.slane %v2486_v7, 1 }
  0x20   : > { %555 = vrot.lane.b32.xlu2 %v503_v26, %s2311_s11  ;;  %v348_v6 = vsel %vm335_vm0, %v346_v61, %v347_v62  ;;  %v342_v13 = vrot.slane %v2491_v9, 1  ;;  %v474_v14 = vrot.slane %v2486_v7, 2  ;;  %v475_v15 = vrot.slane %v2491_v9, 2 }
  0x21   : > { %v481_v8 = vsel %vm468_vm1, %v479_v63, %v480_v1  ;;  %v349_v16 = vrot.slane %v271_v12, 1  ;;  %v482_v23 = vrot.slane %v271_v12, 2  ;;  %v344_v24 = vrot.slane %v268_v22, 1 }
  0x22   : > { %v343_v17 = vsel %vm335_vm0, %v341_v10, %v342_v13  ;;  %v476_v18 = vsel %vm468_vm1, %v474_v14, %v475_v15  ;;  %v477_v25 = vrot.slane %v268_v22, 2  ;;  %v351_v33 = vrot.slane %v2510_v28, 1 }
  0x23   : > { %v350_v21 = vsel %vm335_vm0, %v347_v62, %v349_v16  ;;  %v483_v26 = vsel %vm468_vm1, %v480_v1, %v482_v23  ;;  %v487_v46 = vrot.slane %v274_v34, 2  ;;  %v489_v49 = vrot.slane %v2529_v44, 2  ;;  %v655_v62 = vld [vmem:[%s3481_s1 + $0x8] sm:$0xf]  ;;  %v2099_v16 = vld [vmem:[%s3481_s1 + $0x18] sm:$0xf] }
  0x24   : > { %v478_v30 = vsel %vm468_vm1, %v475_v15, %v477_v25  ;;  %2220 = vmatpush.msk.msra.mxu1 %vm717_vm2, %v655_v62  ;;  %2221 = vmatpush.msk.msra.mxu2 %vm717_vm2, %v655_v62  ;;  %v654_v15 = vld [vmem:[%s3481_s1] sm:$0xff] }
  0x25   : > { %2077 = vmatpush.msk.msra.mxu0 %vm717_vm2, %v655_v62  ;;  %v2645_v62 = vld [vmem:[%s2383_s9 + $0xf8] sm:$0xff] }
  0x26   : > { %424 = vrot.lane.b32.xlu0 %v373_v27, %s2310_s10  ;;  %v345_v27 = vsel %vm335_vm0, %v342_v13, %v344_v24  ;;  %2222 = vmatpush.msra.mxu1 %v654_v15 }
  0x27   : > { %557 = vrot.lane.b32.xlu1 %v506_v29, %s2311_s11  ;;  %v2513_v29 = vld [vmem:[%s2383_s9 + $0x50] sm:$0xff]  ;;  %2223 = vmatpush.msra.mxu2 %v654_v15 }
  0x28   : > { %426 = vrot.lane.b32.xlu2 %v375_v36, %s2310_s10  ;;  %v352_v35 = vrot.slane %v2513_v29, 1  ;;  %v484_v36 = vrot.slane %v2510_v28, 2  ;;  %736 = vmatpush.msra.mxu0 %v654_v15 }
  0x29   : > { %2100 = vmatpush.msk.msrb.mxu1 %vm717_vm2, %v2099_v16 }
  0x2a   : > { %v353_v41 = vsel %vm335_vm0, %v351_v33, %v352_v35 }
  0x2e   : > { %559 = vrot.lane.b32.xlu0 %v508_v37, %s2311_s11  ;;  %v485_v37 = vrot.slane %v2513_v29, 2 }
  0x2f   : > { %432 = vrot.lane.b32.xlu1 %v383_v38, %s2310_s10  ;;  %v354_v38 = vrot.slane %v274_v34, 1  ;;  %v2098_v34 = vld [vmem:[%s3481_s1 + $0x10] sm:$0xff] }
  0x30   : > { %565 = vrot.lane.b32.xlu2 %v516_v47, %s2311_s11  ;;  %v486_v42 = vsel %vm468_vm1, %v484_v36, %v485_v37  ;;  %v356_v47 = vrot.slane %v2529_v44, 1  ;;  %v488_v51 = vsel %vm468_vm1, %v485_v37, %v487_v46  ;;  %845 = vmatpush.msrb.mxu1 %v2098_v34 }
  0x31   : > { %v355_v43 = vsel %vm335_vm0, %v352_v35, %v354_v38 }
  0x36   : > { %428 = vrot.lane.b32.xlu0 %v378_v48, %s2310_s10  ;;  %v357_v48 = vrot.slane %v2532_v45, 1 }
  0x37   : > { %561 = vrot.lane.b32.xlu1 %v511_v50, %s2311_s11  ;;  %v490_v50 = vrot.slane %v2532_v45, 2 }
  0x38   : > { %434 = vrot.lane.b32.xlu2 %v385_v55, %s2310_s10  ;;  %v358_v52 = vsel %vm335_vm0, %v356_v47, %v357_v48  ;;  %v359_v55 = vrot.slane %v277_v53, 1 }
  0x39   : > { %v491_v54 = vsel %vm468_vm1, %v489_v49, %v490_v50 }
  0x3a   : > { %v360_v61 = vsel %vm335_vm0, %v357_v48, %v359_v55  ;;  %v2121_v48 = vld [vmem:[%s3481_s1 + $0x20] sm:$0xff] }
  0x3e   : > { %567 = vrot.lane.b32.xlu0 %v518_v56, %s2311_s11  ;;  %v2546_v56 = vld [vmem:[%s2383_s9 + $0x78] sm:$0xff] }
  0x3f   : > { %430 = vrot.lane.b32.xlu1 %v380_v57, %s2310_s10  ;;  %v492_v57 = vrot.slane %v277_v53, 2  ;;  %v361_v60 = vrot.slane %v2546_v56, 1 }
  0x40   : > { %563 = vrot.lane.b32.xlu2 %v513_v4, %s2311_s11  ;;  %v2562_v4 = vld [vmem:[%s2383_s9] sm:$0xff] }
  0x41   : > { %v493_v63 = vsel %vm468_vm1, %v490_v50, %v492_v57  ;;  %v363_v1 = vsel %vm335_vm0, %v361_v60, %v362_v3  ;;  %v336_v10 = vrot.slane %v2562_v4, 1  ;;  %v469_v3 = vrot.slane %v2562_v4, 2 }
  0x46   : > { %404 = vrot.lane.b32.xlu0 %v348_v6, %s2310_s10  ;;  %v2565_v6 = vld [vmem:[%s2383_s9 + $0x8] sm:$0xff] }
  0x47   : > { %537 = vrot.lane.b32.xlu1 %v481_v8, %s2311_s11  ;;  %v494_v8 = vrot.slane %v2546_v56, 2  ;;  %v337_v12 = vrot.slane %v2565_v6, 1  ;;  %v470_v13 = vrot.slane %v2565_v6, 2 }
  0x48   : > { %400 = vrot.lane.b32.xlu2 %v343_v17, %s2310_s10 }
  0x49   : > { %v496_v14 = vsel %vm468_vm1, %v494_v8, %v495_v11  ;;  %v338_v17 = vsel %vm335_vm0, %v336_v10, %v337_v12  ;;  %v471_v11 = vsel %vm468_vm1, %v469_v3, %v470_v13  ;;  %v387_v8 = vrot.slane %v2645_v62, 1 }
  0x4e   : > { %533 = vrot.lane.b32.xlu0 %v476_v18, %s2311_s11  ;;  %v265_v18 = vld [vmem:[%s2383_s9 + $0x10] sm:$0x3] }
  0x4f   : > { %406 = vrot.lane.b32.xlu1 %v350_v21, %s2310_s10  ;;  %v339_v21 = vrot.slane %v265_v18, 1  ;;  %v472_v23 = vrot.slane %v265_v18, 2 }
  0x50   : > { %539 = vrot.lane.b32.xlu2 %v483_v26, %s2311_s11 }
  0x51   : > { %v340_v24 = vsel %vm335_vm0, %v337_v12, %v339_v21  ;;  %v473_v25 = vsel %vm468_vm1, %v470_v13, %v472_v23 }
  0x56   : > { %402 = vrot.lane.b32.xlu0 %v345_v27, %s2310_s10 }
  0x57   : > { %535 = vrot.lane.b32.xlu1 %v478_v30, %s2311_s11 }
  0x58   : > { %408 = vrot.lane.b32.xlu2 %v353_v41, %s2310_s10 }
  0x5e   : > { %541 = vrot.lane.b32.xlu0 %v486_v42, %s2311_s11  ;;  %v2122_v42 = vld [vmem:[%s3481_s1 + $0x28] sm:$0xf] }
  0x5f   : > { %410 = vrot.lane.b32.xlu1 %v355_v43, %s2310_s10  ;;  %2123 = vmatpush.msk.msrb.mxu2 %vm717_vm2, %v2122_v42 }
  0x60   : > { %543 = vrot.lane.b32.xlu2 %v488_v51, %s2311_s11 }
  0x61   : > { %954 = vmatpush.msrb.mxu2 %v2121_v48 }
  0x66   : > { %412 = vrot.lane.b32.xlu0 %v358_v52, %s2310_s10 }
  0x67   : > { %545 = vrot.lane.b32.xlu1 %v491_v54, %s2311_s11 }
  0x68   : > { %414 = vrot.lane.b32.xlu2 %v360_v61, %s2310_s10 }
  0x6e   : > { %547 = vrot.lane.b32.xlu0 %v493_v63, %s2311_s11 }
  0x6f   : > { %416 = vrot.lane.b32.xlu1 %v363_v1, %s2310_s10 }
  0x70   : > { %549 = vrot.lane.b32.xlu2 %v496_v14, %s2311_s11 }
  0x72   : > { %v423_v22 = vpop.permute.xlu2 %422 }
  0x73   : > { %v615_v50 = vsel %vm601_vm3, %v2394_v5, %v423_v22 }
  0x76   : > { %396 = vrot.lane.b32.xlu0 %v338_v17, %s2310_s10  ;;  %v520_v17 = vrot.slane %v2645_v62, 2 }
  0x77   : > { %529 = vrot.lane.b32.xlu1 %v471_v11, %s2311_s11 }
  0x78   : > { %398 = vrot.lane.b32.xlu2 %v340_v24, %s2310_s10 }
  0x7a   : > { %v556_v26 = vpop.permute.xlu2 %555 }
  0x7b   : > { %v2623_v52 = vsel %vm626_vm4, %v615_v50, %v556_v26 }
  0x7e   : > { %531 = vrot.lane.b32.xlu0 %v473_v25, %s2311_s11 }
  0x82   : > { %v427_v27 = vpop.permute.xlu2 %426 }
  0x83   : > { %v617_v63 = vsel %vm601_vm3, %v2418_v20, %v427_v27  ;;  %v295_v20 = vld [vmem:[%s2383_s9 + $0x100] sm:$0x3]  ;;  %v2688_v27 = vld [vmem:[%s2383_s9 + $0x108] sm:$0xff] }
  0x84   : > { %v389_v16 = vrot.slane %v295_v20, 1  ;;  %v522_v18 = vrot.slane %v295_v20, 2 }
  0x86   : > { %v390_v21 = vsel %vm335_vm0, %v387_v8, %v389_v16 }
  0x87   : > { %438 = vrot.lane.b32.xlu0 %v390_v21, %s2310_s10 }
  0x88   : > { %v419_v30 = vpop.permute.xlu0 %418 }
  0x89   : > { %v421_v33 = vpop.permute.xlu1 %420  ;;  %v613_v35 = vsel %vm601_vm3, %v2386_v0, %v419_v30  ;;  %v2691_v30 = vld [vmem:[%s2383_s9 + $0x110] sm:$0xff] }
  0x8a   : > { %v566_v41 = vpop.permute.xlu2 %565  ;;  %v614_v43 = vsel %vm601_vm3, %v2390_v2, %v421_v33  ;;  %v524_v33 = vrot.slane %v2688_v27, 2  ;;  %v525_v34 = vrot.slane %v2691_v30, 2  ;;  %v392_v48 = vrot.slane %v2691_v30, 1 }
  0x90   : > { %v552_v36 = vpop.permute.xlu0 %551 }
  0x91   : > { %v554_v37 = vpop.permute.xlu1 %553  ;;  %v2602_v38 = vsel %vm626_vm4, %v613_v35, %v552_v36 }
  0x92   : > { %2089 = vmatmul.msk.f32.vlgmr.msra.gmra.mxu1 %vm656_vm5, %v2602_v38  ;;  %v2613_v47 = vsel %vm626_vm4, %v614_v43, %v554_v37  ;;  %v435_v49 = vpop.permute.xlu2 %434 }
  0x93   : > { %v621_v1 = vsel %vm601_vm3, %v2435_v32, %v435_v49 }
  0x98   : > { %v425_v46 = vpop.permute.xlu0 %424 }
  0x99   : > { %v558_v0 = vpop.permute.xlu1 %557  ;;  %v616_v5 = vsel %vm601_vm3, %v2415_v19, %v425_v46 }
  0x9a   : > { %2090 = vmatmul.msk.f32.gmra.mxu1 %vm656_vm5, %v2613_v47  ;;  %v564_v55 = vpop.permute.xlu2 %563  ;;  %v2637_v61 = vsel %vm626_vm4, %v616_v5, %v558_v0  ;;  %v298_v0 = vld [vmem:[%s2383_s9 + $0x118] sm:$0x3] }
  0x9b   : > { %v394_v49 = vrot.slane %v298_v0, 1 }
  0xa0   : > { %v560_v2 = vpop.permute.xlu0 %559 }
  0xa1   : > { %v433_v51 = vpop.permute.xlu1 %432  ;;  %v2655_v14 = vsel %vm626_vm4, %v617_v63, %v560_v2 }
  0xa2   : > { %v620_v53 = vsel %vm601_vm3, %v2432_v31, %v433_v51  ;;  %2091 = vmatmul.msk.f32.gmra.mxu1 %vm656_vm5, %v2623_v52  ;;  %v2642_v31 = vld [vmem:[%s2383_s9 + $0xf0] sm:$0xff]  ;;  %v401_v10 = vpop.permute.xlu2 %400  ;;  %v395_v51 = vsel %vm335_vm0, %v392_v48, %v394_v49 }
  0xa3   : > { %v2630_v54 = vsel %vm626_vm4, %v620_v53, %v566_v41  ;;  %v386_v19 = vrot.slane %v2642_v31, 1  ;;  %v526_v41 = vsel %vm468_vm1, %v524_v33, %v525_v34  ;;  %v519_v50 = vrot.slane %v2642_v31, 2 }
  0xa4   : > { %2096 = vmatmul.msk.f32.vlgmr.msra.gmra.mxu2 %vm656_vm5, %v2630_v54  ;;  %573 = vrot.lane.b32.xlu0 %v526_v41, %s2311_s11 }
  0xa5   : > { %v388_v3 = vsel %vm335_vm0, %v386_v19, %v387_v8  ;;  %v521_v5 = vsel %vm468_vm1, %v519_v50, %v520_v17 }
  0xa6   : > { %436 = vrot.lane.b32.xlu1 %v388_v3, %s2310_s10  ;;  %569 = vrot.lane.b32.xlu2 %v521_v5, %s2311_s11 }
  0xa8   : > { %v429_v57 = vpop.permute.xlu0 %428 }
  0xa9   : > { %v562_v60 = vpop.permute.xlu1 %561  ;;  %v618_v32 = vsel %vm601_vm3, %v2446_v39, %v429_v57  ;;  %v523_v39 = vsel %vm468_vm1, %v520_v17, %v522_v18 }
  0xaa   : > { %2092 = vmatmul.msk.f32.gmra.mxu1 %vm656_vm5, %v2637_v61  ;;  %v2673_v24 = vsel %vm626_vm4, %v618_v32, %v562_v60  ;;  %v540_v25 = vpop.permute.xlu2 %539 }
  0xae   : > { %571 = vrot.lane.b32.xlu1 %v523_v39, %s2311_s11 }
  0xb0   : > { %v568_v12 = vpop.permute.xlu0 %567 }
  0xb1   : > { %v431_v13 = vpop.permute.xlu1 %430  ;;  %v2658_v15 = vsel %vm626_vm4, %v621_v1, %v568_v12 }
  0xb2   : > { %2093 = vmatmul.msk.f32.gmra.mxu1 %vm656_vm5, %v2655_v14  ;;  %2097 = vmatmul.msk.f32.gmra.mxu2 %vm656_vm5, %v2658_v15  ;;  %v409_v46 = vpop.permute.xlu2 %408 }
  0xb3   : > { %v608_v60 = vsel %vm601_vm3, %v2510_v28, %v409_v46 }
  0xb6   : > { %442 = vrot.lane.b32.xlu1 %v395_v51, %s2310_s10 }
  0xb8   : > { %v405_v11 = vpop.permute.xlu0 %404 }
  0xb9   : > { %v606_v22 = vsel %vm601_vm3, %v2472_v58, %v405_v11  ;;  %v538_v23 = vpop.permute.xlu1 %537  ;;  %v619_v58 = vsel %vm601_vm3, %v2449_v40, %v431_v13  ;;  %v2707_v40 = vld [vmem:[%s3484_s4] sm:$0x1] }
  0xba   : > { %v2678_v26 = vsel %vm626_vm4, %v606_v22, %v538_v23  ;;  %2094 = vmatmul.msk.f32.gmra.mxu1 %vm656_vm5, %v2673_v24  ;;  %v2696_v37 = vsel %vm626_vm4, %v619_v58, %v564_v55 }
  0xbb   : > { %2124 = vmatmul.msk.f32.vlgmr.msrb.gmra.mxu2 %vm656_vm5, %v2678_v26 }
  0xc0   : > { %v534_v35 = vpop.permute.xlu0 %533 }
  0xc1   : > { %v407_v36 = vpop.permute.xlu1 %406 }
  0xc2   : > { %v607_v42 = vsel %vm601_vm3, %v2475_v59, %v407_v36  ;;  %2095 = vmatmul.msk.f32.gmra.mxu1 %vm656_vm5, %v2696_v37  ;;  %v604_v59 = vsel %vm601_vm3, %v2486_v7, %v401_v10  ;;  %v544_v7 = vpop.permute.xlu2 %543  ;;  %v391_v10 = vrot.slane %v2688_v27, 1 }
  0xc3   : > { %v2710_v43 = vsel %vm626_vm4, %v607_v42, %v540_v25  ;;  %v629_v53 = vsel %vm626_vm4, %v604_v59, %v534_v35 }
  0xc4   : > { %2125 = vmatmul.msk.f32.gmra.mxu2 %vm656_vm5, %v2710_v43 }
  0xc8   : > { %v403_v2 = vpop.permute.xlu0 %402 }
  0xc9   : > { %v536_v55 = vpop.permute.xlu1 %535  ;;  %v605_v57 = vsel %vm601_vm3, %v2491_v9, %v403_v2  ;;  %v393_v9 = vsel %vm335_vm0, %v391_v10, %v392_v48 }
  0xca   : > { %2101 = vmatmul.msk.f32.vlgmr.msrb.gmra.mxu1 %vm656_vm5, %v629_v53  ;;  %v630_v19 = vsel %vm626_vm4, %v605_v57, %v536_v55  ;;  %440 = vrot.lane.b32.xlu2 %v393_v9, %s2310_s10  ;;  %v415_v3 = vpop.permute.xlu2 %414 }
  0xcb   : > { %v611_v22 = vsel %vm601_vm3, %v2532_v45, %v415_v3 }
  0xd0   : > { %v542_v63 = vpop.permute.xlu0 %541 }
  0xd1   : > { %v411_v1 = vpop.permute.xlu1 %410  ;;  %v633_v8 = vsel %vm626_vm4, %v608_v60, %v542_v63 }
  0xd2   : > { %2102 = vmatmul.msk.f32.gmra.mxu1 %vm656_vm5, %v630_v19  ;;  %2126 = vmatmul.msk.f32.gmra.mxu2 %vm656_vm5, %v633_v8  ;;  %v609_v12 = vsel %vm601_vm3, %v2513_v29, %v411_v1  ;;  %v527_v29 = vrot.slane %v298_v0, 2  ;;  %v550_v11 = vpop.permute.xlu2 %549 }
  0xd3   : > { %v634_v28 = vsel %vm626_vm4, %v609_v12, %v544_v7 }
  0xd4   : > { %v528_v21 = vsel %vm468_vm1, %v525_v34, %v527_v29 }
  0xd5   : > { %575 = vrot.lane.b32.xlu2 %v528_v21, %s2311_s11 }
  0xd8   : > { %v413_v13 = vpop.permute.xlu0 %412 }
  0xd9   : > { %v546_v20 = vpop.permute.xlu1 %545  ;;  %v610_v32 = vsel %vm601_vm3, %v2529_v44, %v413_v13 }
  0xda   : > { %2103 = vmatmul.msk.f32.gmra.mxu1 %vm656_vm5, %v2678_v26  ;;  %2127 = vmatmul.msk.f32.gmra.mxu2 %vm656_vm5, %v634_v28  ;;  %v635_v16 = vsel %vm626_vm4, %v610_v32, %v546_v20  ;;  %v399_v33 = vpop.permute.xlu2 %398 }
  0xdb   : > { %v603_v45 = vsel %vm601_vm3, %v2565_v6, %v399_v33 }
  0xe0   : > { %v548_v17 = vpop.permute.xlu0 %547 }
  0xe1   : > { %v417_v18 = vpop.permute.xlu1 %416  ;;  %v636_v44 = vsel %vm626_vm4, %v611_v22, %v548_v17 }
  0xe2   : > { %2104 = vmatmul.msk.f32.gmra.mxu1 %vm656_vm5, %v2710_v43  ;;  %2128 = vmatmul.msk.f32.gmra.mxu2 %vm656_vm5, %v635_v16  ;;  %v612_v34 = vsel %vm601_vm3, %v2546_v56, %v417_v18 }
  0xe3   : > { %v637_v35 = vsel %vm626_vm4, %v612_v34, %v550_v11 }
  0xe8   : > { %v397_v23 = vpop.permute.xlu0 %396 }
  0xe9   : > { %v602_v25 = vsel %vm601_vm3, %v2562_v4, %v397_v23  ;;  %v530_v39 = vpop.permute.xlu1 %529 }
  0xea   : > { %2105 = vmatmul.msk.f32.gmra.mxu1 %vm656_vm5, %v633_v8  ;;  %2129 = vmatmul.msk.f32.gmra.mxu2 %vm656_vm5, %v636_v44  ;;  %v627_v58 = vsel %vm626_vm4, %v602_v25, %v530_v39 }
  0xeb   : > { %2078 = vmatmul.msk.f32.vlgmr.msra.gmra.mxu0 %vm656_vm5, %v627_v58 }
  0xf0   : > { %v532_v36 = vpop.permute.xlu0 %531 }
  0xf1   : > { %v628_v4 = vsel %vm626_vm4, %v603_v45, %v532_v36 }
  0xf2   : > { %2106 = vmatmul.msk.f32.gmra.mxu1 %vm656_vm5, %v634_v28  ;;  %2130 = vmatmul.msk.f32.gmra.mxu2 %vm656_vm5, %v637_v35 }
  0xf3   : > { %2079 = vmatmul.msk.f32.gmra.mxu0 %vm656_vm5, %v628_v4 }
  0xf9   : > { %v439_v59 = vpop.permute.xlu0 %438 }
  0xfa   : > { %2107 = vmatmul.msk.f32.gmra.mxu1 %vm656_vm5, %v635_v16  ;;  %2131 = vmatmul.msk.f32.gmra.mxu2 %vm656_vm5, %v2602_v38  ;;  %v623_v48 = vsel %vm601_vm3, %v2645_v62, %v439_v59 }
  0xfb   : > { %2080 = vmatmul.msk.f32.gmra.mxu0 %vm656_vm5, %v629_v53 }
 0x102   : > { %2108 = vmatmul.msk.f32.gmra.mxu1 %vm656_vm5, %v636_v44  ;;  %2132 = vmatmul.msk.f32.gmra.mxu2 %vm656_vm5, %v2613_v47 }
 0x103   : > { %2081 = vmatmul.msk.f32.gmra.mxu0 %vm656_vm5, %v630_v19 }
 0x10a   : > { %2109 = vmatmul.msk.f32.gmra.mxu1 %vm656_vm5, %v637_v35  ;;  %2133 = vmatmul.msk.f32.gmra.mxu2 %vm656_vm5, %v2623_v52 }
 0x10b   : > { %2082 = vmatmul.msk.f32.gmra.mxu0 %vm656_vm5, %v2678_v26 }
 0x10f   : > { %v2781_v56 = vpop.f32.mrf.mxu1 }
 0x112   : > { %2110 = vmatmul.msk.f32.gmra.mxu1 %vm656_vm5, %v2602_v38  ;;  %2134 = vmatmul.msk.f32.gmra.mxu2 %vm656_vm5, %v2637_v61 }
 0x113   : > { %2083 = vmatmul.msk.f32.gmra.mxu0 %vm656_vm5, %v2710_v43  ;;  %v570_v43 = vpop.permute.xlu2 %569 }
 0x116   : > { %v574_v53 = vpop.permute.xlu0 %573 }
 0x117   : > { %v2789_v6 = vpop.f32.mrf.mxu1 }
 0x118   : > { %v437_v42 = vpop.permute.xlu1 %436 }
 0x11a   : > { %2111 = vmatmul.msk.f32.gmra.mxu1 %vm656_vm5, %v2613_v47  ;;  %2135 = vmatmul.msk.f32.gmra.mxu2 %vm656_vm5, %v2655_v14 }
 0x11b   : > { %2084 = vmatmul.msk.f32.gmra.mxu0 %vm656_vm5, %v633_v8 }
 0x11f   : > { %v2796_v26 = vpop.f32.mrf.mxu1 }
 0x120   : > { %v572_v49 = vpop.permute.xlu1 %571 }
 0x121   : > { %v648_v2 = vsel %vm626_vm4, %v623_v48, %v572_v49 }
 0x122   : > { %2112 = vmatmul.msk.f32.gmra.mxu1 %vm656_vm5, %v2623_v52  ;;  %2136 = vmatmul.msk.f32.gmra.mxu2 %vm656_vm5, %v2673_v24 }
 0x123   : > { %2085 = vmatmul.msk.f32.gmra.mxu0 %vm656_vm5, %v634_v28 }
 0x127   : > { %v2803_v38 = vpop.f32.mrf.mxu1  ;;  %v2812_v41 = vpop.f32.mrf.mxu2 }
 0x128   : > { %v443_v7 = vpop.permute.xlu1 %442 }
 0x129   : > { %v625_v62 = vsel %vm601_vm3, %v2691_v30, %v443_v7 }
 0x12a   : > { %2113 = vmatmul.msk.f32.gmra.mxu1 %vm656_vm5, %v2637_v61  ;;  %2137 = vmatmul.msk.f32.gmra.mxu2 %vm656_vm5, %v2696_v37 }
 0x12b   : > { %2086 = vmatmul.msk.f32.gmra.mxu0 %vm656_vm5, %v635_v16 }
 0x12f   : > { %v2810_v47 = vpop.f32.mrf.mxu1 }
 0x132   : > { %2114 = vmatmul.msk.f32.gmra.mxu1 %vm656_vm5, %v2655_v14  ;;  %2138 = vmatmul.msk.f32.gmra.mxu2 %vm656_vm5, %v2630_v54  ;;  %v622_v14 = vsel %vm601_vm3, %v2642_v31, %v437_v42  ;;  %v441_v31 = vpop.permute.xlu2 %440 }
 0x133   : > { %2087 = vmatmul.msk.f32.gmra.mxu0 %vm656_vm5, %v636_v44  ;;  %v647_v0 = vsel %vm626_vm4, %v622_v14, %v570_v43 }
 0x135   : > { %v2821_v61 = vpop.f32.mrf.mxu2 }
 0x137   : > { %v2819_v52 = vpop.f32.mrf.mxu1 }
 0x13a   : > { %2115 = vmatmul.msk.f32.gmra.mxu1 %vm656_vm5, %v2673_v24  ;;  %2139 = vmatmul.msk.f32.gmra.mxu2 %vm656_vm5, %v2658_v15 }
 0x13b   : > { %2088 = vmatmul.msk.f32.gmra.mxu0 %vm656_vm5, %v637_v35 }
 0x13e   : > { %v956_v24 = vpop.f32.mrf.mxu2 }
 0x13f   : > { %v2830_v46 = vpop.f32.mrf.mxu1 }
 0x142   : > { %2116 = vmatmul.msk.f32.gmra.mxu1 %vm656_vm5, %v2696_v37  ;;  %2140 = vmatmul.msk.f32.gmra.mxu2 %vm656_vm5, %v647_v0  ;;  %v624_v37 = vsel %vm601_vm3, %v2688_v27, %v441_v31 }
 0x143   : > { %v649_v5 = vsel %vm626_vm4, %v624_v37, %v574_v53 }
 0x147   : > { %v847_v50 = vpop.f32.mrf.mxu1  ;;  %v959_v51 = vpop.f32.mrf.mxu2 }
 0x14a   : > { %2117 = vmatmul.msk.f32.gmra.mxu1 %vm656_vm5, %v2630_v54  ;;  %2141 = vmatmul.msk.f32.gmra.mxu2 %vm656_vm5, %v648_v2  ;;  %v576_v54 = vpop.permute.xlu2 %575 }
 0x14b   : > { %v650_v63 = vsel %vm626_vm4, %v625_v62, %v576_v54 }
 0x14f   : > { %v850_v55 = vpop.f32.mrf.mxu1 }
 0x152   : > { %2118 = vmatmul.msk.f32.gmra.mxu1 %vm656_vm5, %v2658_v15  ;;  %2142 = vmatmul.msk.f32.gmra.mxu2 %vm656_vm5, %v649_v5  ;;  %v2857_v15 = vld [vmem:[%s3482_s2] ss:$0 sm:$0xff] }
 0x155   : > { %v962_v57 = vpop.f32.mrf.mxu2 }
 0x157   : > { %v853_v60 = vpop.f32.mrf.mxu1 }
 0x15a   : > { %2119 = vmatmul.msk.f32.gmra.mxu1 %vm656_vm5, %v647_v0  ;;  %2143 = vmatmul.msk.f32.gmra.mxu2 %vm656_vm5, %v650_v63 }
 0x15d   : > { %v965_v27 = vpop.f32.mrf.mxu2 }
 0x15f   : > { %v856_v1 = vpop.f32.mrf.mxu1 }
 0x162   : > { %2120 = vmatmul.msk.f32.gmra.mxu1 %vm656_vm5, %v648_v2 }
 0x165   : > { %v968_v19 = vpop.f32.mrf.mxu2 }
 0x167   : > { %v859_v30 = vpop.f32.mrf.mxu1 }
 0x168   : > { %v738_v8 = vpop.f32.mrf.mxu0 }
 0x169   : > { %v798_v10 = vadd.f32 %v2857_v15, %v738_v8  ;;  %v809_v8 = vadd.f32 %v2857_v15, %v2781_v56  ;;  %v810_v56 = vadd.f32 %v2857_v15, %v2789_v6 }
 0x16b   : > { %v907_v12 = vadd.f32 %v847_v50, %v798_v10 }
 0x16d   : > { %v1016_v9 = vadd.f32 %v956_v24, %v907_v12  ;;  %v971_v28 = vpop.f32.mrf.mxu2 }
 0x16f   : > { %vm1036_vm6 = vcmp.gt.f32.partialorder %v1016_v9, 0.0  ;;  %v1056_v3 = vmul.f32 0.2, %v1016_v9  ;;  %v862_v13 = vpop.f32.mrf.mxu1 }
 0x170   : > { %v741_v20 = vpop.f32.mrf.mxu0 }
 0x171   : > { %v1076_v32 = vsel %vm1036_vm6, %v1016_v9, %v1056_v3  ;;  %v799_v16 = vadd.f32 %v2857_v15, %v741_v20 }
 0x172   : > { %1096 = vst.msk [vmem:[#allocation2 + $0x8] sm:$0xff] %vm601_vm3, %v1076_v32 }
 0x173   : > { %1117 = vst.msk [vmem:[#allocation2 + $0x6] sm:$0x2] %vm1116_vm7, %v1076_v32  ;;  %v908_v29 = vadd.f32 %v850_v55, %v799_v16 }
 0x175   : > { %v1017_v17 = vadd.f32 %v959_v51, %v908_v29  ;;  %v974_v18 = vpop.f32.mrf.mxu2 }
 0x177   : > { %vm1037_vm8 = vcmp.gt.f32.partialorder %v1017_v17, 0.0  ;;  %v1057_v11 = vmul.f32 0.2, %v1017_v17  ;;  %v865_v21 = vpop.f32.mrf.mxu1 }
 0x178   : > { %v744_v22 = vpop.f32.mrf.mxu0 }
 0x179   : > { %v1077_v44 = vsel %vm1037_vm8, %v1017_v17, %v1057_v11  ;;  %v800_v23 = vadd.f32 %v2857_v15, %v744_v22 }
 0x17a   : > { %1097 = vst.msk [vmem:[#allocation2 + $0x10] sm:$0xff] %vm601_vm3, %v1077_v44 }
 0x17b   : > { %1128 = vst.msk [vmem:[#allocation2 + $0x12] sm:$0x40] %vm1127_vm9, %v1077_v44  ;;  %v909_v25 = vadd.f32 %v853_v60, %v800_v23 }
 0x17d   : > { %v1018_v39 = vadd.f32 %v962_v57, %v909_v25  ;;  %v977_v58 = vpop.f32.mrf.mxu2 }
 0x17f   : > { %vm1038_vm10 = vcmp.gt.f32.partialorder %v1018_v39, 0.0  ;;  %v1058_v33 = vmul.f32 0.2, %v1018_v39  ;;  %v868_v34 = vpop.f32.mrf.mxu1 }
 0x180   : > { %v747_v45 = vpop.f32.mrf.mxu0 }
 0x181   : > { %v1078_v35 = vsel %vm1038_vm10, %v1018_v39, %v1058_v33  ;;  %v801_v36 = vadd.f32 %v2857_v15, %v747_v45  ;;  %v811_v45 = vadd.f32 %v2857_v15, %v2796_v26 }
 0x182   : > { %1098 = vst.msk [vmem:[#allocation2 + $0x28] sm:$0xff] %vm601_vm3, %v1078_v35 }
 0x183   : > { %1118 = vst.msk [vmem:[#allocation2 + $0x26] sm:$0x2] %vm1116_vm7, %v1078_v35  ;;  %v910_v4 = vadd.f32 %v856_v1, %v801_v36 }
 0x185   : > { %v1019_v42 = vadd.f32 %v965_v27, %v910_v4  ;;  %v2869_v14 = vpop.f32.mrf.mxu2 }
 0x187   : > { %vm1039_vm11 = vcmp.gt.f32.partialorder %v1019_v42, 0.0  ;;  %v1059_v43 = vmul.f32 0.2, %v1019_v42  ;;  %v871_v0 = vpop.f32.mrf.mxu1 }
 0x188   : > { %v750_v59 = vpop.f32.mrf.mxu0 }
 0x189   : > { %v1079_v24 = vsel %vm1039_vm11, %v1019_v42, %v1059_v43  ;;  %v802_v48 = vadd.f32 %v2857_v15, %v750_v59 }
 0x18a   : > { %1099 = vst.msk [vmem:[#allocation2 + $0x30] sm:$0xff] %vm601_vm3, %v1079_v24 }
 0x18b   : > { %1129 = vst.msk [vmem:[#allocation2 + $0x32] sm:$0x40] %vm1127_vm9, %v1079_v24  ;;  %v911_v49 = vadd.f32 %v859_v30, %v802_v48 }
 0x18d   : > { %v1020_v50 = vadd.f32 %v968_v19, %v911_v49  ;;  %v2874_v2 = vpop.f32.mrf.mxu2 }
 0x18f   : > { %vm1040_vm12 = vcmp.gt.f32.partialorder %v1020_v50, 0.0  ;;  %v1060_v31 = vmul.f32 0.2, %v1020_v50  ;;  %v2876_v51 = vpop.f32.mrf.mxu1 }
 0x190   : > { %v753_v37 = vpop.f32.mrf.mxu0 }
 0x191   : > { %v1080_v53 = vsel %vm1040_vm12, %v1020_v50, %v1060_v31  ;;  %v803_v55 = vadd.f32 %v2857_v15, %v753_v37  ;;  %v812_v50 = vadd.f32 %v2857_v15, %v2803_v38 }
 0x192   : > { %1100 = vst.msk [vmem:[#allocation2 + $0x48] sm:$0xff] %vm601_vm3, %v1080_v53 }
 0x193   : > { %1119 = vst.msk [vmem:[#allocation2 + $0x46] sm:$0x2] %vm1116_vm7, %v1080_v53  ;;  %v912_v5 = vadd.f32 %v862_v13, %v803_v55 }
 0x195   : > { %v1021_v7 = vadd.f32 %v971_v28, %v912_v5  ;;  %v2881_v62 = vpop.f32.mrf.mxu2 }
 0x197   : > { %vm1041_vm13 = vcmp.gt.f32.partialorder %v1021_v7, 0.0  ;;  %v1061_v54 = vmul.f32 0.2, %v1021_v7  ;;  %v2883_v57 = vpop.f32.mrf.mxu1 }
 0x198   : > { %v756_v60 = vpop.f32.mrf.mxu0 }
 0x199   : > { %v1081_v63 = vsel %vm1041_vm13, %v1021_v7, %v1061_v54  ;;  %v804_v27 = vadd.f32 %v2857_v15, %v756_v60 }
 0x19a   : > { %1101 = vst.msk [vmem:[#allocation2 + $0x50] sm:$0xff] %vm601_vm3, %v1081_v63 }
 0x19b   : > { %1130 = vst.msk [vmem:[#allocation2 + $0x52] sm:$0x40] %vm1127_vm9, %v1081_v63  ;;  %v913_v1 = vadd.f32 %v865_v21, %v804_v27  ;;  %v813_v27 = vadd.f32 %v2857_v15, %v2810_v47  ;;  %v814_v47 = vadd.f32 %v2857_v15, %v2819_v52 }
 0x19d   : > { %v1022_v19 = vadd.f32 %v974_v18, %v913_v1  ;;  %v989_v30 = vpop.f32.mrf.mxu2 }
 0x19f   : > { %vm1042_vm14 = vcmp.gt.f32.partialorder %v1022_v19, 0.0  ;;  %v1062_v10 = vmul.f32 0.2, %v1022_v19  ;;  %v880_v12 = vpop.f32.mrf.mxu1 }
 0x1a0   : > { %v918_v9 = vadd.f32 %v880_v12, %v809_v8  ;;  %v759_v28 = vpop.f32.mrf.mxu0 }
 0x1a1   : > { %v1082_v3 = vsel %vm1042_vm14, %v1022_v19, %v1062_v10  ;;  %v805_v13 = vadd.f32 %v2857_v15, %v759_v28 }
 0x1a2   : > { %1102 = vst.msk [vmem:[#allocation2 + $0x68] sm:$0xff] %vm601_vm3, %v1082_v3  ;;  %v1027_v20 = vadd.f32 %v989_v30, %v918_v9 }
 0x1a3   : > { %1120 = vst.msk [vmem:[#allocation2 + $0x66] sm:$0x2] %vm1116_vm7, %v1082_v3  ;;  %v914_v32 = vadd.f32 %v868_v34, %v805_v13 }
 0x1a4   : > { %vm1047_vm15 = vcmp.gt.f32.partialorder %v1027_v20, 0.0  ;;  %v1067_v16 = vmul.f32 0.2, %v1027_v20 }
 0x1a5   : > { %v1023_v29 = vadd.f32 %v977_v58, %v914_v32  ;;  %v992_v17 = vpop.f32.mrf.mxu2 }
 0x1a6   : > { %v1087_v18 = vsel %vm1047_vm15, %v1027_v20, %v1067_v16  ;;  %v815_v16 = vadd.f32 %v2857_v15, %v2830_v46 }
 0x1a7   : > { %1107 = vst.msk [vmem:[#allocation2 + $0xb0] sm:$0xff] %vm601_vm3, %v1087_v18  ;;  %vm1043_vm6 = vcmp.gt.f32.partialorder %v1023_v29, 0.0  ;;  %v1063_v11 = vmul.f32 0.2, %v1023_v29  ;;  %v883_v21 = vpop.f32.mrf.mxu1 }
 0x1a8   : > { %1133 = vst.msk [vmem:[#allocation2 + $0xb2] sm:$0x40] %vm1127_vm9, %v1087_v18  ;;  %v919_v22 = vadd.f32 %v883_v21, %v810_v56  ;;  %v762_v44 = vpop.f32.mrf.mxu0  ;;  %v816_v21 = vadd.f32 %v2857_v15, %v2812_v41 }
 0x1a9   : > { %v1083_v23 = vsel %vm1043_vm6, %v1023_v29, %v1063_v11  ;;  %v806_v25 = vadd.f32 %v2857_v15, %v762_v44 }
 0x1aa   : > { %1103 = vst.msk [vmem:[#allocation2 + $0x70] sm:$0xff] %vm601_vm3, %v1083_v23  ;;  %v1028_v39 = vadd.f32 %v992_v17, %v919_v22 }
 0x1ab   : > { %1131 = vst.msk [vmem:[#allocation2 + $0x72] sm:$0x40] %vm1127_vm9, %v1083_v23  ;;  %v915_v58 = vadd.f32 %v871_v0, %v806_v25 }
 0x1ac   : > { %vm1048_vm8 = vcmp.gt.f32.partialorder %v1028_v39, 0.0  ;;  %v1068_v6 = vmul.f32 0.2, %v1028_v39 }
 0x1ad   : > { %v1024_v33 = vadd.f32 %v2869_v14, %v915_v58  ;;  %v995_v34 = vpop.f32.mrf.mxu2 }
 0x1ae   : > { %v1088_v35 = vsel %vm1048_vm8, %v1028_v39, %v1068_v6  ;;  %v817_v39 = vadd.f32 %v2857_v15, %v2821_v61 }
 0x1af   : > { %1108 = vst.msk [vmem:[#allocation2 + $0xc8] sm:$0xff] %vm601_vm3, %v1088_v35  ;;  %vm1044_vm10 = vcmp.gt.f32.partialorder %v1024_v33, 0.0  ;;  %v1064_v36 = vmul.f32 0.2, %v1024_v33  ;;  %v886_v4 = vpop.f32.mrf.mxu1 }
 0x1b0   : > { %1123 = vst.msk [vmem:[#allocation2 + $0xc6] sm:$0x2] %vm1116_vm7, %v1088_v35  ;;  %v920_v42 = vadd.f32 %v886_v4, %v811_v45  ;;  %v765_v43 = vpop.f32.mrf.mxu0 }
 0x1b1   : > { %v1084_v59 = vsel %vm1044_vm10, %v1024_v33, %v1064_v36  ;;  %v807_v0 = vadd.f32 %v2857_v15, %v765_v43 }
 0x1b2   : > { %1104 = vst.msk [vmem:[#allocation2 + $0x88] sm:$0xff] %vm601_vm3, %v1084_v59  ;;  %v1029_v14 = vadd.f32 %v995_v34, %v920_v42 }
 0x1b3   : > { %1121 = vst.msk [vmem:[#allocation2 + $0x86] sm:$0x2] %vm1116_vm7, %v1084_v59  ;;  %v916_v26 = vadd.f32 %v2876_v51, %v807_v0 }
 0x1b4   : > { %vm1049_vm11 = vcmp.gt.f32.partialorder %v1029_v14, 0.0  ;;  %v1069_v24 = vmul.f32 0.2, %v1029_v14 }
 0x1b5   : > { %v1025_v48 = vadd.f32 %v2874_v2, %v916_v26  ;;  %v998_v49 = vpop.f32.mrf.mxu2 }
 0x1b6   : > { %v1089_v31 = vsel %vm1049_vm11, %v1029_v14, %v1069_v24 }
 0x1b7   : > { %1109 = vst.msk [vmem:[#allocation2 + $0xd0] sm:$0xff] %vm601_vm3, %v1089_v31  ;;  %vm1045_vm12 = vcmp.gt.f32.partialorder %v1025_v48, 0.0  ;;  %v1065_v37 = vmul.f32 0.2, %v1025_v48  ;;  %v889_v53 = vpop.f32.mrf.mxu1 }
 0x1b8   : > { %1134 = vst.msk [vmem:[#allocation2 + $0xd2] sm:$0x40] %vm1127_vm9, %v1089_v31  ;;  %v921_v55 = vadd.f32 %v889_v53, %v812_v50  ;;  %v768_v5 = vpop.f32.mrf.mxu0 }
 0x1b9   : > { %v1085_v7 = vsel %vm1045_vm12, %v1025_v48, %v1065_v37  ;;  %v808_v51 = vadd.f32 %v2857_v15, %v768_v5 }
 0x1ba   : > { %1105 = vst.msk [vmem:[#allocation2 + $0x90] sm:$0xff] %vm601_vm3, %v1085_v7  ;;  %v1030_v2 = vadd.f32 %v998_v49, %v921_v55 }
 0x1bb   : > { %1132 = vst.msk [vmem:[#allocation2 + $0x92] sm:$0x40] %vm1127_vm9, %v1085_v7  ;;  %v917_v38 = vadd.f32 %v2883_v57, %v808_v51 }
 0x1bc   : > { %vm1050_vm13 = vcmp.gt.f32.partialorder %v1030_v2, 0.0  ;;  %v1070_v54 = vmul.f32 0.2, %v1030_v2 }
 0x1bd   : > { %v1026_v60 = vadd.f32 %v2881_v62, %v917_v38  ;;  %v1001_v63 = vpop.f32.mrf.mxu2 }
 0x1be   : > { %v1090_v1 = vsel %vm1050_vm13, %v1030_v2, %v1070_v54 }
 0x1bf   : > { %1110 = vst.msk [vmem:[#allocation2 + $0xe8] sm:$0xff] %vm601_vm3, %v1090_v1  ;;  %vm1046_vm14 = vcmp.gt.f32.partialorder %v1026_v60, 0.0  ;;  %v1066_v19 = vmul.f32 0.2, %v1026_v60  ;;  %v892_v30 = vpop.f32.mrf.mxu1 }
 0x1c0   : > { %1124 = vst.msk [vmem:[#allocation2 + $0xe6] sm:$0x2] %vm1116_vm7, %v1090_v1  ;;  %v922_v8 = vadd.f32 %v892_v30, %v813_v27 }
 0x1c1   : > { %v1086_v10 = vsel %vm1046_vm14, %v1026_v60, %v1066_v19 }
 0x1c2   : > { %1106 = vst.msk [vmem:[#allocation2 + $0xa8] sm:$0xff] %vm601_vm3, %v1086_v10  ;;  %v1031_v57 = vadd.f32 %v1001_v63, %v922_v8 }
 0x1c3   : > { %1122 = vst.msk [vmem:[#allocation2 + $0xa6] sm:$0x2] %vm1116_vm7, %v1086_v10 }
 0x1c4   : > { %vm1051_vm15 = vcmp.gt.f32.partialorder %v1031_v57, 0.0  ;;  %v1071_v62 = vmul.f32 0.2, %v1031_v57 }
 0x1c5   : > { %v1004_v12 = vpop.f32.mrf.mxu2 }
 0x1c6   : > { %v1091_v9 = vsel %vm1051_vm15, %v1031_v57, %v1071_v62 }
 0x1c7   : > { %1111 = vst.msk [vmem:[#allocation2 + $0xf0] sm:$0xff] %vm601_vm3, %v1091_v9  ;;  %v895_v28 = vpop.f32.mrf.mxu1 }
 0x1c8   : > { %1135 = vst.msk [vmem:[#allocation2 + $0xf2] sm:$0x40] %vm1127_vm9, %v1091_v9  ;;  %v923_v3 = vadd.f32 %v895_v28, %v814_v47 }
 0x1ca   : > { %v1032_v13 = vadd.f32 %v1004_v12, %v923_v3 }
 0x1cc   : > { %vm1052_vm6 = vcmp.gt.f32.partialorder %v1032_v13, 0.0  ;;  %v1072_v20 = vmul.f32 0.2, %v1032_v13 }
 0x1cd   : > { %v1007_v32 = vpop.f32.mrf.mxu2 }
 0x1ce   : > { %v1092_v29 = vsel %vm1052_vm6, %v1032_v13, %v1072_v20 }
 0x1cf   : > { %1112 = vst.msk [vmem:[#allocation2 + $0x108] sm:$0xff] %vm601_vm3, %v1092_v29  ;;  %v898_v17 = vpop.f32.mrf.mxu1 }
 0x1d0   : > { %1125 = vst.msk [vmem:[#allocation2 + $0x106] sm:$0x2] %vm1116_vm7, %v1092_v29  ;;  %v924_v52 = vadd.f32 %v898_v17, %v815_v16 }
 0x1d2   : > { %v1033_v56 = vadd.f32 %v1007_v32, %v924_v52 }
 0x1d4   : > { %vm1053_vm8 = vcmp.gt.f32.partialorder %v1033_v56, 0.0  ;;  %v1073_v18 = vmul.f32 0.2, %v1033_v56 }
 0x1d5   : > { %v1010_v11 = vpop.f32.mrf.mxu2 }
 0x1d6   : > { %v1093_v22 = vsel %vm1053_vm8, %v1033_v56, %v1073_v18 }
 0x1d7   : > { %1113 = vst.msk [vmem:[#allocation2 + $0x110] sm:$0xff] %vm601_vm3, %v1093_v22  ;;  %v901_v44 = vpop.f32.mrf.mxu1 }
 0x1d8   : > { %1136 = vst.msk [vmem:[#allocation2 + $0x112] sm:$0x40] %vm1127_vm9, %v1093_v22  ;;  %v925_v46 = vadd.f32 %v901_v44, %v816_v21 }
 0x1da   : > { %v1034_v23 = vadd.f32 %v1010_v11, %v925_v46 }
 0x1dc   : > { %vm1054_vm10 = vcmp.gt.f32.partialorder %v1034_v23, 0.0  ;;  %v1074_v25 = vmul.f32 0.2, %v1034_v23 }
 0x1dd   : > { %v1013_v33 = vpop.f32.mrf.mxu2 }
 0x1de   : > { %v1094_v58 = vsel %vm1054_vm10, %v1034_v23, %v1074_v25 }
 0x1df   : > { %1114 = vst.msk [vmem:[#allocation2 + $0x128] sm:$0xff] %vm601_vm3, %v1094_v58  ;;  %v904_v6 = vpop.f32.mrf.mxu1 }
 0x1e0   : > { %1126 = vst.msk [vmem:[#allocation2 + $0x126] sm:$0x2] %vm1116_vm7, %v1094_v58  ;;  %v926_v41 = vadd.f32 %v904_v6, %v817_v39 }
 0x1e2   : > { %v1035_v34 = vadd.f32 %v1013_v33, %v926_v41 }
 0x1e4   : > { %vm1055_vm11 = vcmp.gt.f32.partialorder %v1035_v34, 0.0  ;;  %v1075_v45 = vmul.f32 0.2, %v1035_v34  ;;  %1141 = sbr.rel (%p2144_p6) target bundleno = 494 (0x1ee), region = 44 }
 0x1e6   : > { %v1095_v35 = vsel %vm1055_vm11, %v1035_v34, %v1075_v45 }
 0x1e7   : > { %1115 = vst.msk [vmem:[#allocation2 + $0x130] sm:$0xff] %vm601_vm3, %v1095_v35 }
 0x1e8   : > { %1137 = vst.msk [vmem:[#allocation2 + $0x132] sm:$0x40] %vm1127_vm9, %v1095_v35 }
 0x1e9   : > { %v1143_v61 = vld [vmem:[#allocation2 + $0x40] sm:$0xff]  ;;  %v1144_v15 = vld [vmem:[#allocation2 + $0x48] sm:$0xff]  ;;  %v1145_v36 = vld [vmem:[#allocation2 + $0x50] sm:$0xff]  ;;  %vm1150_vm12 = vcmask 24576  }
 0x1ea   : > { %1147 = vst.msk [vmem:[#allocation2] sm:$0xff] %vm601_vm3, %v1143_v61  ;;  %v1146_v4 = vld [vmem:[#allocation2 + $0x58] sm:$0x1] }
 0x1eb   : > { %1148 = vst.msk [vmem:[#allocation2 + $0x8] sm:$0xff] %vm601_vm3, %v1144_v15 }
 0x1ec   : > { %1149 = vst.msk [vmem:[#allocation2 + $0x10] sm:$0xff] %vm601_vm3, %v1145_v36 }
 0x1ed   : > { %1151 = vst.msk [vmem:[#allocation2 + $0x18] sm:$0x1] %vm1150_vm12, %v1146_v4 }
 0x1ee PF: > { %p2145_p7 = scmp.ne.s32.totalorder %s2292_s18, 1 }
 0x1f0   : > { %1155 = sbr.rel (%p2145_p7) target bundleno = 506 (0x1fa), region = 48 }
 0x1f5   : > { %v1157_v42 = vld [vmem:[#allocation2 + $0xe0] sm:$0xff]  ;;  %v1158_v43 = vld [vmem:[#allocation2 + $0xe8] sm:$0xff]  ;;  %v1159_v59 = vld [vmem:[#allocation2 + $0xf0] sm:$0xff]  ;;  %vm1165_vm7 = vcmask 24576  }
 0x1f6   : > { %1162 = vst.msk [vmem:[#allocation2 + $0x120] sm:$0xff] %vm601_vm3, %v1157_v42  ;;  %v1160_v0 = vld [vmem:[#allocation2 + $0xf8] sm:$0x1] }
 0x1f7   : > { %1163 = vst.msk [vmem:[#allocation2 + $0x128] sm:$0xff] %vm601_vm3, %v1158_v43 }
 0x1f8   : > { %1164 = vst.msk [vmem:[#allocation2 + $0x130] sm:$0xff] %vm601_vm3, %v1159_v59 }
 0x1f9   : > { %1166 = vst.msk [vmem:[#allocation2 + $0x138] sm:$0x1] %vm1165_vm7, %v1160_v0 }
 0x1fa PF: > { %v2951_v14 = vld [vmem:[#allocation2 + $0x48] sm:$0xff]  ;;  %v2953_v26 = vld [vmem:[#allocation2 + $0x50] sm:$0xff]  ;;  %v1178_v31 = vld [vmem:[#allocation2 + $0x58] sm:$0x1]  ;;  %vm1584_vm9 = vcmask 1040384  }
 0x1fb   : > { %v1367_v24 = vrot.slane %v2951_v14, 2  ;;  %v1368_v48 = vrot.slane %v2953_v26, 2  ;;  %v1233_v49 = vrot.slane %v2951_v14, 1  ;;  %v1234_v50 = vrot.slane %v2953_v26, 1  ;;  %v2965_v55 = vld [vmem:[#allocation2 + $0x68] sm:$0xff]  ;;  %v2970_v51 = vld [vmem:[#allocation2 + $0x70] sm:$0xff] }
 0x1fc   : > { %v1236_v5 = vrot.slane %v2965_v55, 1  ;;  %v1370_v7 = vrot.slane %v1178_v31, 2  ;;  %v1237_v2 = vrot.slane %v2970_v51, 1  ;;  %v1372_v60 = vrot.slane %v2965_v55, 2  ;;  %v1182_v1 = vld [vmem:[#allocation2 + $0x78] sm:$0x1] }
 0x1fd   : > { %v1369_v37 = vsel %vm468_vm1, %v1367_v24, %v1368_v48  ;;  %v1235_v53 = vsel %vm335_vm0, %v1233_v49, %v1234_v50  ;;  %v1373_v63 = vrot.slane %v2970_v51, 2  ;;  %v2984_v19 = vld [vmem:[#allocation2 + $0x88] sm:$0xff]  ;;  %v1375_v30 = vrot.slane %v1182_v1, 2  ;;  %v2986_v8 = vld [vmem:[#allocation2 + $0x90] sm:$0xff]  ;;  %v1186_v3 = vld [vmem:[#allocation2 + $0x98] sm:$0x1] }
 0x1fe   : > { %1421 = vrot.lane.b32.xlu1 %v1369_v37, %s2311_s11  ;;  %1271 = vrot.lane.b32.xlu0 %v1235_v53, %s2310_s10  ;;  %v1371_v38 = vsel %vm468_vm1, %v1368_v48, %v1370_v7  ;;  %v1238_v54 = vsel %vm335_vm0, %v1236_v5, %v1237_v2  ;;  %v1240_v10 = vrot.slane %v2986_v8, 1  ;;  %v1239_v57 = vrot.slane %v2984_v19, 1  ;;  %v3001_v13 = vld [vmem:[#allocation2 + $0xa8] sm:$0xff]  ;;  %v3003_v32 = vld [vmem:[#allocation2 + $0xb0] sm:$0xff]  ;;  %v1190_v21 = vld [vmem:[#allocation2 + $0xb8] sm:$0x1] }
 0x1ff   : > { %1275 = vrot.lane.b32.xlu2 %v1236_v5, %s2310_s10  ;;  %v1374_v27 = vsel %vm468_vm1, %v1372_v60, %v1373_v63  ;;  %v1376_v62 = vsel %vm468_vm1, %v1373_v63, %v1375_v30  ;;  %v1377_v47 = vrot.slane %v2984_v19, 2  ;;  %v1378_v9 = vrot.slane %v2986_v8, 2  ;;  %v3018_v22 = vld [vmem:[#allocation2 + $0xc8] sm:$0xff]  ;;  %v3020_v46 = vld [vmem:[#allocation2 + $0xd0] sm:$0xff]  ;;  %v1194_v34 = vld [vmem:[#allocation2 + $0xd8] sm:$0x1] }
 0x200   : > { %v1241_v12 = vsel %vm335_vm0, %v1239_v57, %v1240_v10  ;;  %v1380_v20 = vrot.slane %v1186_v3, 2  ;;  %v1243_v16 = vrot.slane %v3003_v32, 1  ;;  %v1242_v29 = vrot.slane %v3001_v13, 1  ;;  %v3035_v45 = vld [vmem:[#allocation2 + $0xe8] sm:$0xff]  ;;  %v3037_v61 = vld [vmem:[#allocation2 + $0xf0] sm:$0xff]  ;;  %v1625_v1 = vld [vmem:[%s3483_s3] sm:$0xff] }
 0x201   : > { %v1379_v28 = vsel %vm468_vm1, %v1377_v47, %v1378_v9  ;;  %v1382_v56 = vrot.slane %v3001_v13, 2  ;;  %v1383_v18 = vrot.slane %v3003_v32, 2  ;;  %v1385_v44 = vrot.slane %v1190_v21, 2  ;;  %v1198_v48 = vld [vmem:[#allocation2 + $0xf8] sm:$0x1]  ;;  %v3052_v31 = vld [vmem:[#allocation2 + $0x28] sm:$0xff] }
 0x202   : > { %v1381_v17 = vsel %vm468_vm1, %v1378_v9, %v1380_v20  ;;  %v1244_v52 = vsel %vm335_vm0, %v1242_v29, %v1243_v16  ;;  %v1246_v23 = vrot.slane %v3020_v46, 1  ;;  %v1245_v25 = vrot.slane %v3018_v22, 1  ;;  %v3054_v37 = vld [vmem:[#allocation2 + $0x30] sm:$0xff]  ;;  %v1626_v63 = vld [vmem:[%s3483_s3 + $0x8] sm:$0xf] }
 0x203   : > { %v1384_v11 = vsel %vm468_vm1, %v1382_v56, %v1383_v18  ;;  %v1386_v39 = vsel %vm468_vm1, %v1383_v18, %v1385_v44  ;;  %v1387_v6 = vrot.slane %v3018_v22, 2  ;;  %v1388_v33 = vrot.slane %v3020_v46, 2  ;;  %2224 = vmatpush.msk.msra.mxu3 %vm717_vm2, %v1626_v63  ;;  %2146 = vmatpush.msk.msra.mxu2 %vm717_vm2, %v1626_v63  ;;  %v1174_v30 = vld [vmem:[#allocation2 + $0x38] sm:$0x1]  ;;  %v3089_v9 = vld [vmem:[#allocation2 + $0x8] sm:$0xff] }
 0x204   : > { %v1247_v58 = vsel %vm335_vm0, %v1245_v25, %v1246_v23  ;;  %v1390_v35 = vrot.slane %v1194_v34, 2  ;;  %v1249_v15 = vrot.slane %v3037_v61, 1  ;;  %v1248_v36 = vrot.slane %v3035_v45, 1  ;;  %v1170_v18 = vld [vmem:[#allocation2 + $0x18] sm:$0x1]  ;;  %v1179_v34 = vld [vmem:[#allocation2 + $0x60] sm:$0xff] }
 0x205   : > { %v1389_v41 = vsel %vm468_vm1, %v1387_v6, %v1388_v33  ;;  %v1392_v43 = vrot.slane %v3035_v45, 2  ;;  %v1393_v59 = vrot.slane %v3037_v61, 2  ;;  %v1231_v53 = vrot.slane %v3054_v37, 1  ;;  %2225 = vmatpush.msra.mxu3 %v1625_v1  ;;  %1677 = vmatpush.msra.mxu2 %v1625_v1 }
 0x206   : > { %1423 = vrot.lane.b32.xlu1 %v1371_v38, %s2311_s11  ;;  %1273 = vrot.lane.b32.xlu0 %v1234_v50, %s2310_s10  ;;  %v1391_v4 = vsel %vm468_vm1, %v1388_v33, %v1390_v35  ;;  %v1250_v42 = vsel %vm335_vm0, %v1248_v36, %v1249_v15  ;;  %v1395_v50 = vrot.slane %v1198_v48, 2  ;;  %v1230_v5 = vrot.slane %v3052_v31, 1 }
 0x207   : > { %1277 = vrot.lane.b32.xlu2 %v1238_v54, %s2310_s10  ;;  %v1394_v0 = vsel %vm468_vm1, %v1392_v43, %v1393_v59  ;;  %v1362_v38 = vrot.slane %v3052_v31, 2  ;;  %v1363_v54 = vrot.slane %v3054_v37, 2  ;;  %v1227_v3 = vrot.slane %v3089_v9, 1 }
 0x208   : > { %v1396_v7 = vsel %vm468_vm1, %v1393_v59, %v1395_v50 }
 0x20e   : > { %1427 = vrot.lane.b32.xlu1 %v1374_v27, %s2311_s11  ;;  %1425 = vrot.lane.b32.xlu0 %v1372_v60, %s2311_s11  ;;  %v1364_v27 = vsel %vm468_vm1, %v1362_v38, %v1363_v54 }
 0x20f   : > { %1279 = vrot.lane.b32.xlu2 %v1237_v2, %s2310_s10  ;;  %v1232_v2 = vsel %vm335_vm0, %v1230_v5, %v1231_v53 }
 0x216   : > { %1281 = vrot.lane.b32.xlu1 %v1239_v57, %s2310_s10  ;;  %1429 = vrot.lane.b32.xlu0 %v1376_v62, %s2311_s11  ;;  %v1365_v57 = vrot.slane %v1174_v30, 2 }
 0x217   : > { %1283 = vrot.lane.b32.xlu2 %v1241_v12, %s2310_s10 }
 0x218   : > { %v1366_v12 = vsel %vm468_vm1, %v1363_v54, %v1365_v57 }
 0x21e   : > { %1433 = vrot.lane.b32.xlu1 %v1379_v28, %s2311_s11  ;;  %1431 = vrot.lane.b32.xlu0 %v1377_v47, %s2311_s11  ;;  %v3083_v47 = vld [vmem:[#allocation2 + $0x10] sm:$0xff] }
 0x21f   : > { %1285 = vrot.lane.b32.xlu2 %v1240_v10, %s2310_s10  ;;  %v2164_v10 = vld [vmem:[%s3483_s3 + $0x18] sm:$0xf]  ;;  %v1228_v28 = vrot.slane %v3083_v47, 1 }
 0x220   : > { %2165 = vmatpush.msk.msrb.mxu3 %vm717_vm2, %v2164_v10 }
 0x226   : > { %1287 = vrot.lane.b32.xlu1 %v1242_v29, %s2310_s10  ;;  %1435 = vrot.lane.b32.xlu0 %v1381_v17, %s2311_s11  ;;  %v1358_v29 = vrot.slane %v3083_v47, 2 }
 0x227   : > { %1289 = vrot.lane.b32.xlu2 %v1244_v52, %s2310_s10 }
 0x22e   : > { %1439 = vrot.lane.b32.xlu1 %v1384_v11, %s2311_s11  ;;  %1437 = vrot.lane.b32.xlu0 %v1382_v56, %s2311_s11  ;;  %v1360_v11 = vrot.slane %v1170_v18, 2 }
 0x22f   : > { %1291 = vrot.lane.b32.xlu2 %v1243_v16, %s2310_s10  ;;  %v1229_v16 = vsel %vm335_vm0, %v1227_v3, %v1228_v28 }
 0x230   : > { %v1361_v44 = vsel %vm468_vm1, %v1358_v29, %v1360_v11  ;;  %v1187_v11 = vld [vmem:[#allocation2 + $0xa0] sm:$0xff] }
 0x236   : > { %1293 = vrot.lane.b32.xlu1 %v1245_v25, %s2310_s10  ;;  %1441 = vrot.lane.b32.xlu0 %v1386_v39, %s2311_s11 }
 0x237   : > { %1295 = vrot.lane.b32.xlu2 %v1247_v58, %s2310_s10 }
 0x23e   : > { %1445 = vrot.lane.b32.xlu1 %v1389_v41, %s2311_s11  ;;  %1443 = vrot.lane.b32.xlu0 %v1387_v6, %s2311_s11 }
 0x23f   : > { %1297 = vrot.lane.b32.xlu2 %v1246_v23, %s2310_s10 }
 0x246   : > { %1299 = vrot.lane.b32.xlu1 %v1248_v36, %s2310_s10  ;;  %1447 = vrot.lane.b32.xlu0 %v1391_v4, %s2311_s11 }
 0x247   : > { %1301 = vrot.lane.b32.xlu2 %v1250_v42, %s2310_s10 }
 0x24e   : > { %1451 = vrot.lane.b32.xlu1 %v1394_v0, %s2311_s11  ;;  %1449 = vrot.lane.b32.xlu0 %v1392_v43, %s2311_s11 }
 0x24f   : > { %1303 = vrot.lane.b32.xlu2 %v1249_v15, %s2310_s10 }
 0x256   : > { %1453 = vrot.lane.b32.xlu0 %v1396_v7, %s2311_s11  ;;  %1263 = vrot.lane.b32.xlu1 %v1230_v5, %s2310_s10 }
 0x257   : > { %1265 = vrot.lane.b32.xlu2 %v1232_v2, %s2310_s10 }
 0x259   : > { %v1276_v60 = vpop.permute.xlu2 %1275 }
 0x25a   : > { %v1506_v15 = vsel %vm601_vm3, %v1179_v34, %v1276_v60  ;;  %v1183_v60 = vld [vmem:[#allocation2 + $0x80] sm:$0xff] }
 0x25e   : > { %1413 = vrot.lane.b32.xlu0 %v1362_v38, %s2311_s11  ;;  %1415 = vrot.lane.b32.xlu1 %v1364_v27, %s2311_s11  ;;  %v2163_v38 = vld [vmem:[%s3483_s3 + $0x10] sm:$0xff] }
 0x25f   : > { %1267 = vrot.lane.b32.xlu2 %v1231_v53, %s2310_s10  ;;  %1776 = vmatpush.msrb.mxu3 %v2163_v38 }
 0x261   : > { %v1278_v62 = vpop.permute.xlu2 %1277 }
 0x266   : > { %1269 = vrot.lane.b32.xlu0 %v1233_v49, %s2310_s10  ;;  %1417 = vrot.lane.b32.xlu1 %v1366_v12, %s2311_s11  ;;  %v1357_v49 = vrot.slane %v3089_v9, 2 }
 0x267   : > { %1419 = vrot.lane.b32.xlu2 %v1367_v24, %s2311_s11 }
 0x268   : > { %v1359_v24 = vsel %vm468_vm1, %v1357_v49, %v1358_v29 }
 0x269   : > { %v1280_v20 = vpop.permute.xlu2 %1279 }
 0x26a   : > { %v1508_v53 = vsel %vm601_vm3, %v2970_v51, %v1280_v20 }
 0x26e   : > { %1257 = vrot.lane.b32.xlu0 %v1227_v3, %s2310_s10  ;;  %1259 = vrot.lane.b32.xlu1 %v1229_v16, %s2310_s10  ;;  %v3152_v3 = vld [vmem:[#allocation2 + $0x108] sm:$0xff] }
 0x26f   : > { %1407 = vrot.lane.b32.xlu2 %v1357_v49, %s2311_s11  ;;  %v1251_v20 = vrot.slane %v3152_v3, 1 }
 0x270   : > { %v1422_v17 = vpop.permute.xlu1 %1421  ;;  %v1272_v52 = vpop.permute.xlu0 %1271 }
 0x271   : > { %v1284_v56 = vpop.permute.xlu2 %1283  ;;  %v1504_v21 = vsel %vm601_vm3, %v2951_v14, %v1272_v52 }
 0x272   : > { %v3109_v23 = vsel %vm626_vm4, %v1504_v21, %v1422_v17  ;;  %v1510_v27 = vsel %vm601_vm3, %v2984_v19, %v1284_v56  ;;  %v3161_v56 = vld [vmem:[#allocation2 + $0x110] sm:$0xff] }
 0x273   : > { %v1596_v14 = vrot.slane %v3109_v23, 7  ;;  %v1252_v18 = vrot.slane %v3161_v56, 1 }
 0x275   : > { %v1253_v21 = vsel %vm335_vm0, %v1251_v20, %v1252_v18 }
 0x276   : > { %1409 = vrot.lane.b32.xlu0 %v1359_v24, %s2311_s11  ;;  %1261 = vrot.lane.b32.xlu1 %v1228_v28, %s2310_s10 }
 0x277   : > { %1411 = vrot.lane.b32.xlu2 %v1361_v44, %s2311_s11  ;;  %v1398_v44 = vrot.slane %v3161_v56, 2 }
 0x278   : > { %v1424_v25 = vpop.permute.xlu1 %1423  ;;  %v1274_v39 = vpop.permute.xlu0 %1273 }
 0x279   : > { %v1505_v58 = vsel %vm601_vm3, %v2953_v26, %v1274_v39  ;;  %v1286_v41 = vpop.permute.xlu2 %1285  ;;  %v1507_v26 = vsel %vm601_vm3, %v2965_v55, %v1278_v62 }
 0x27a   : > { %v1535_v6 = vsel %vm626_vm4, %v1505_v58, %v1424_v25  ;;  %v1511_v19 = vsel %vm601_vm3, %v2986_v8, %v1286_v41  ;;  %v1397_v8 = vrot.slane %v3152_v3, 2 }
 0x27b   : > { %v1598_v33 = vrot.slane %v1535_v6, 7 }
 0x27c   : > { %v1399_v25 = vsel %vm468_vm1, %v1397_v8, %v1398_v44 }
 0x27d   : > { %v3119_v35 = vsel %vm1584_vm9, %v1596_v14, %v1598_v33 }
 0x27e   : > { %2152 = vmatmul.msk.f32.vlgmr.msra.gmra.mxu3 %vm656_vm5, %v3119_v35  ;;  %1305 = vrot.lane.b32.xlu0 %v1251_v20, %s2310_s10 }
 0x27f   : > { %1307 = vrot.lane.b32.xlu1 %v1253_v21, %s2310_s10  ;;  %1455 = vrot.lane.b32.xlu2 %v1397_v8, %s2311_s11  ;;  %v1202_v21 = vld [vmem:[#allocation2 + $0x118] sm:$0x1] }
 0x280   : > { %v1428_v36 = vpop.permute.xlu1 %1427  ;;  %v1426_v4 = vpop.permute.xlu0 %1425 }
 0x281   : > { %v1537_v42 = vsel %vm626_vm4, %v1507_v26, %v1428_v36  ;;  %v1536_v43 = vsel %vm626_vm4, %v1506_v15, %v1426_v4  ;;  %v1290_v50 = vpop.permute.xlu2 %1289 }
 0x282   : > { %v1601_v59 = vrot.slane %v1537_v42, 7  ;;  %v1600_v0 = vrot.slane %v1536_v43, 7  ;;  %v1513_v58 = vsel %vm601_vm3, %v3001_v13, %v1290_v50  ;;  %v3186_v42 = vld [vmem:[#allocation2 + $0x128] sm:$0xff] }
 0x283   : > { %v1254_v13 = vrot.slane %v3186_v42, 1 }
 0x284   : > { %v3129_v48 = vsel %vm1584_vm9, %v1600_v0, %v1601_v59 }
 0x286   : > { %2153 = vmatmul.msk.f32.gmra.mxu3 %vm656_vm5, %v3129_v48  ;;  %1457 = vrot.lane.b32.xlu0 %v1399_v25, %s2311_s11  ;;  %v1195_v25 = vld [vmem:[#allocation2 + $0xe0] sm:$0xff] }
 0x287   : > { %1309 = vrot.lane.b32.xlu1 %v1252_v18, %s2310_s10  ;;  %v2183_v18 = vld [vmem:[%s3483_s3 + $0x28] sm:$0xf] }
 0x288   : > { %v1282_v5 = vpop.permute.xlu1 %1281  ;;  %v1430_v55 = vpop.permute.xlu0 %1429  ;;  %2184 = vmatpush.msk.msrb.mxu0 %vm717_vm2, %v2183_v18 }
 0x289   : > { %v1538_v7 = vsel %vm626_vm4, %v1508_v53, %v1430_v55  ;;  %v1292_v63 = vpop.permute.xlu2 %1291  ;;  %v1509_v51 = vsel %vm601_vm3, %v1183_v60, %v1282_v5  ;;  %v3196_v5 = vld [vmem:[#allocation2 + $0x130] sm:$0xff] }
 0x28a   : > { %v1603_v2 = vrot.slane %v1538_v7, 7  ;;  %v1514_v43 = vsel %vm601_vm3, %v3003_v32, %v1292_v63  ;;  %v1255_v55 = vrot.slane %v3196_v5, 1  ;;  %v1402_v32 = vrot.slane %v3186_v42, 2 }
 0x28b   : > { %v1403_v63 = vrot.slane %v3196_v5, 2 }
 0x28c   : > { %v3140_v54 = vsel %vm1584_vm9, %v1601_v59, %v1603_v2  ;;  %v1191_v2 = vld [vmem:[#allocation2 + $0xc0] sm:$0xff]  ;;  %v1256_v60 = vsel %vm335_vm0, %v1254_v13, %v1255_v55 }
 0x28e   : > { %2154 = vmatmul.msk.f32.gmra.mxu3 %vm656_vm5, %v3140_v54  ;;  %1311 = vrot.lane.b32.xlu0 %v1254_v13, %s2310_s10 }
 0x28f   : > { %1313 = vrot.lane.b32.xlu1 %v1256_v60, %s2310_s10  ;;  %v1171_v60 = vld [vmem:[#allocation2 + $0x20] sm:$0xff] }
 0x290   : > { %v1434_v1 = vpop.permute.xlu1 %1433  ;;  %v1432_v30 = vpop.permute.xlu0 %1431 }
 0x291   : > { %v1540_v10 = vsel %vm626_vm4, %v1510_v27, %v1434_v1  ;;  %v1539_v57 = vsel %vm626_vm4, %v1509_v51, %v1432_v30  ;;  %v1296_v17 = vpop.permute.xlu2 %1295  ;;  %v1404_v51 = vsel %vm468_vm1, %v1402_v32, %v1403_v63 }
 0x292   : > { %v1606_v62 = vrot.slane %v1540_v10, 7  ;;  %v1605_v12 = vrot.slane %v1539_v57, 7  ;;  %v1516_v1 = vsel %vm601_vm3, %v3018_v22, %v1296_v17 }
 0x294   : > { %v3150_v28 = vsel %vm1584_vm9, %v1605_v12, %v1606_v62 }
 0x296   : > { %2155 = vmatmul.msk.f32.gmra.mxu3 %vm656_vm5, %v3150_v28  ;;  %1463 = vrot.lane.b32.xlu0 %v1404_v51, %s2311_s11 }
 0x297   : > { %1315 = vrot.lane.b32.xlu1 %v1255_v55, %s2310_s10  ;;  %v1206_v55 = vld [vmem:[#allocation2 + $0x138] sm:$0x1] }
 0x298   : > { %v1288_v16 = vpop.permute.xlu1 %1287  ;;  %v1436_v49 = vpop.permute.xlu0 %1435 }
 0x299   : > { %v1541_v29 = vsel %vm626_vm4, %v1511_v19, %v1436_v49  ;;  %v1512_v39 = vsel %vm601_vm3, %v1187_v11, %v1288_v16  ;;  %v1298_v36 = vpop.permute.xlu2 %1297  ;;  %v2182_v11 = vld [vmem:[%s3483_s3 + $0x20] sm:$0xff] }
 0x29a   : > { %v1608_v52 = vrot.slane %v1541_v29, 7  ;;  %v1517_v22 = vsel %vm601_vm3, %v3020_v46, %v1298_v36  ;;  %v1400_v46 = vrot.slane %v1202_v21, 2  ;;  %1875 = vmatpush.msrb.mxu0 %v2182_v11 }
 0x29c   : > { %v3165_v24 = vsel %vm1584_vm9, %v1606_v62, %v1608_v52 }
 0x29e   : > { %2156 = vmatmul.msk.f32.gmra.mxu3 %vm656_vm5, %v3165_v24 }
 0x2a0   : > { %v1440_v6 = vpop.permute.xlu1 %1439  ;;  %v1438_v33 = vpop.permute.xlu0 %1437 }
 0x2a1   : > { %v1543_v41 = vsel %vm626_vm4, %v1513_v58, %v1440_v6  ;;  %v1542_v34 = vsel %vm626_vm4, %v1512_v39, %v1438_v33  ;;  %v1302_v38 = vpop.permute.xlu2 %1301  ;;  %v1401_v39 = vsel %vm468_vm1, %v1398_v44, %v1400_v46 }
 0x2a2   : > { %v1611_v15 = vrot.slane %v1543_v41, 7  ;;  %v1610_v26 = vrot.slane %v1542_v34, 7  ;;  %1459 = vrot.lane.b32.xlu2 %v1401_v39, %s2311_s11  ;;  %v1519_v6 = vsel %vm601_vm3, %v3035_v45, %v1302_v38  ;;  %v1405_v38 = vrot.slane %v1206_v55, 2 }
 0x2a4   : > { %v3184_v4 = vsel %vm1584_vm9, %v1610_v26, %v1611_v15 }
 0x2a6   : > { %2157 = vmatmul.msk.f32.gmra.mxu3 %vm656_vm5, %v3184_v4 }
 0x2a8   : > { %v1294_v59 = vpop.permute.xlu1 %1293  ;;  %v1442_v0 = vpop.permute.xlu0 %1441 }
 0x2a9   : > { %v1544_v50 = vsel %vm626_vm4, %v1514_v43, %v1442_v0  ;;  %v1515_v27 = vsel %vm601_vm3, %v1191_v2, %v1294_v59  ;;  %v1304_v16 = vpop.permute.xlu2 %1303 }
 0x2aa   : > { %v1613_v53 = vrot.slane %v1544_v50, 7  ;;  %1461 = vrot.lane.b32.xlu2 %v1402_v32, %s2311_s11  ;;  %v1520_v45 = vsel %vm601_vm3, %v3037_v61, %v1304_v16  ;;  %v1406_v32 = vsel %vm468_vm1, %v1403_v63, %v1405_v38  ;;  %v1175_v63 = vld [vmem:[#allocation2 + $0x40] sm:$0xff] }
 0x2ac   : > { %v3200_v7 = vsel %vm1584_vm9, %v1611_v15, %v1613_v53 }
 0x2ae   : > { %2158 = vmatmul.msk.f32.gmra.mxu3 %vm656_vm5, %v3200_v7 }
 0x2b0   : > { %v1446_v30 = vpop.permute.xlu1 %1445  ;;  %v1444_v10 = vpop.permute.xlu0 %1443 }
 0x2b1   : > { %v1546_v57 = vsel %vm626_vm4, %v1516_v1, %v1446_v30  ;;  %v1545_v62 = vsel %vm626_vm4, %v1515_v27, %v1444_v10  ;;  %v1266_v26 = vpop.permute.xlu2 %1265 }
 0x2b2   : > { %v1616_v12 = vrot.slane %v1546_v57, 7  ;;  %v1615_v20 = vrot.slane %v1545_v62, 7  ;;  %1465 = vrot.lane.b32.xlu2 %v1406_v32, %s2311_s11  ;;  %v1501_v51 = vsel %vm601_vm3, %v3052_v31, %v1266_v26 }
 0x2b4   : > { %v3216_v19 = vsel %vm1584_vm9, %v1615_v20, %v1616_v12 }
 0x2b6   : > { %2159 = vmatmul.msk.f32.gmra.mxu3 %vm656_vm5, %v3216_v19 }
 0x2b8   : > { %v1300_v49 = vpop.permute.xlu1 %1299  ;;  %v1448_v29 = vpop.permute.xlu0 %1447 }
 0x2b9   : > { %v1547_v17 = vsel %vm626_vm4, %v1517_v22, %v1448_v29  ;;  %v1518_v58 = vsel %vm601_vm3, %v1195_v25, %v1300_v49  ;;  %v1268_v53 = vpop.permute.xlu2 %1267 }
 0x2ba   : > { %v1618_v52 = vrot.slane %v1547_v17, 7  ;;  %v1502_v16 = vsel %vm601_vm3, %v3054_v37, %v1268_v53  ;;  %v1167_v37 = vld [vmem:[#allocation2] sm:$0xff] }
 0x2bc   : > { %v3232_v8 = vsel %vm1584_vm9, %v1616_v12, %v1618_v52 }
 0x2be   : > { %2160 = vmatmul.msk.f32.gmra.mxu3 %vm656_vm5, %v3232_v8 }
 0x2c0   : > { %v1452_v33 = vpop.permute.xlu1 %1451  ;;  %v1450_v41 = vpop.permute.xlu0 %1449 }
 0x2c1   : > { %v1549_v34 = vsel %vm626_vm4, %v1519_v6, %v1452_v33  ;;  %v1548_v15 = vsel %vm626_vm4, %v1518_v58, %v1450_v41  ;;  %v1420_v20 = vpop.permute.xlu2 %1419 }
 0x2c2   : > { %v1621_v36 = vrot.slane %v1549_v34, 7  ;;  %v1620_v13 = vrot.slane %v1548_v15, 7 }
 0x2c4   : > { %v3246_v43 = vsel %vm1584_vm9, %v1620_v13, %v1621_v36 }
 0x2c6   : > { %2161 = vmatmul.msk.f32.gmra.mxu3 %vm656_vm5, %v3246_v43 }
 0x2c8   : > { %v1454_v44 = vpop.permute.xlu0 %1453  ;;  %v1264_v59 = vpop.permute.xlu1 %1263 }
 0x2c9   : > { %v1550_v0 = vsel %vm626_vm4, %v1520_v45, %v1454_v44  ;;  %v1500_v61 = vsel %vm601_vm3, %v1171_v60, %v1264_v59  ;;  %v1408_v46 = vpop.permute.xlu2 %1407 }
 0x2ca   : > { %v1623_v50 = vrot.slane %v1550_v0, 7 }
 0x2cc   : > { %v3255_v2 = vsel %vm1584_vm9, %v1621_v36, %v1623_v50  ;;  %v1199_v50 = vld [vmem:[#allocation2 + $0x100] sm:$0xff] }
 0x2ce   : > { %2162 = vmatmul.msk.f32.gmra.mxu3 %vm656_vm5, %v3255_v2 }
 0x2d0   : > { %v1414_v27 = vpop.permute.xlu0 %1413  ;;  %v1416_v1 = vpop.permute.xlu1 %1415 }
 0x2d1   : > { %v1530_v30 = vsel %vm626_vm4, %v1500_v61, %v1414_v27  ;;  %v1531_v10 = vsel %vm626_vm4, %v1501_v51, %v1416_v1 }
 0x2d2   : > { %v1590_v57 = vrot.slane %v1530_v30, 7  ;;  %v1591_v62 = vrot.slane %v1531_v10, 7 }
 0x2d4   : > { %v1592_v12 = vsel %vm1584_vm9, %v1590_v57, %v1591_v62  ;;  %v1203_v57 = vld [vmem:[#allocation2 + $0x120] sm:$0xff] }
 0x2d6   : > { %2166 = vmatmul.msk.f32.vlgmr.msrb.gmra.mxu3 %vm656_vm5, %v1592_v12 }
 0x2d8   : > { %v1270_v22 = vpop.permute.xlu0 %1269  ;;  %v1418_v49 = vpop.permute.xlu1 %1417 }
 0x2d9   : > { %v1503_v31 = vsel %vm601_vm3, %v1175_v63, %v1270_v22  ;;  %v1532_v29 = vsel %vm626_vm4, %v1502_v16, %v1418_v49 }
 0x2da   : > { %v1593_v17 = vrot.slane %v1532_v29, 7  ;;  %v1533_v52 = vsel %vm626_vm4, %v1503_v31, %v1420_v20 }
 0x2db   : > { %v1595_v18 = vrot.slane %v1533_v52, 7 }
 0x2dc   : > { %v1594_v11 = vsel %vm1584_vm9, %v1591_v62, %v1593_v17 }
 0x2dd   : > { %v1597_v21 = vsel %vm1584_vm9, %v1595_v18, %v1596_v14  ;;  %v1412_v14 = vpop.permute.xlu2 %1411 }
 0x2de   : > { %2167 = vmatmul.msk.f32.gmra.mxu3 %vm656_vm5, %v1594_v11  ;;  %2185 = vmatmul.msk.f32.vlgmr.msrb.gmra.mxu0 %vm656_vm5, %v1597_v21 }
 0x2e0   : > { %v1258_v25 = vpop.permute.xlu0 %1257  ;;  %v1260_v39 = vpop.permute.xlu1 %1259 }
 0x2e1   : > { %v1497_v58 = vsel %vm601_vm3, %v1167_v37, %v1258_v25  ;;  %v1498_v23 = vsel %vm601_vm3, %v3089_v9, %v1260_v39 }
 0x2e2   : > { %v1527_v6 = vsel %vm626_vm4, %v1497_v58, %v1408_v46 }
 0x2e3   : > { %v1585_v33 = vrot.slane %v1527_v6, 7 }
 0x2e5   : > { %v1456_v0 = vpop.permute.xlu2 %1455 }
 0x2e6   : > { %2168 = vmatmul.msk.f32.gmra.mxu3 %vm656_vm5, %v1597_v21  ;;  %2186 = vmatmul.msk.f32.gmra.mxu0 %vm656_vm5, %v3119_v35 }
 0x2e8   : > { %v1410_v41 = vpop.permute.xlu0 %1409  ;;  %v1262_v34 = vpop.permute.xlu1 %1261 }
 0x2e9   : > { %v1528_v15 = vsel %vm626_vm4, %v1498_v23, %v1410_v41  ;;  %v1499_v26 = vsel %vm601_vm3, %v3083_v47, %v1262_v34 }
 0x2ea   : > { %v1586_v36 = vrot.slane %v1528_v15, 7  ;;  %v1529_v13 = vsel %vm626_vm4, %v1499_v26, %v1412_v14 }
 0x2eb   : > { %v1588_v9 = vrot.slane %v1529_v13, 7  ;;  %v2201_v13 = vld [vmem:[%s2383_s9 + $0x31] sm:$0xff] }
 0x2ec   : > { %v1587_v45 = vsel %vm1584_vm9, %v1585_v33, %v1586_v36  ;;  %v3388_v33 = vperm.slane %v2707_v40, 0 }
 0x2ed   : > { %2147 = vmatmul.msk.f32.vlgmr.msra.gmra.mxu2 %vm656_vm5, %v1587_v45  ;;  %v1589_v44 = vsel %vm1584_vm9, %v1586_v36, %v1588_v9 }
 0x2ee   : > { %2169 = vmatmul.msk.f32.gmra.mxu3 %vm656_vm5, %v3119_v35  ;;  %2187 = vmatmul.msk.f32.gmra.mxu0 %vm656_vm5, %v3129_v48 }
 0x2f1   : > { %v1308_v59 = vpop.permute.xlu1 %1307 }
 0x2f5   : > { %2148 = vmatmul.msk.f32.gmra.mxu2 %vm656_vm5, %v1589_v44 }
 0x2f6   : > { %2170 = vmatmul.msk.f32.gmra.mxu3 %vm656_vm5, %v3129_v48  ;;  %2188 = vmatmul.msk.f32.gmra.mxu0 %vm656_vm5, %v3140_v54 }
 0x2f9   : > { %v1310_v38 = vpop.permute.xlu1 %1309 }
 0x2fd   : > { %2149 = vmatmul.msk.f32.gmra.mxu2 %vm656_vm5, %v1592_v12 }
 0x2fe   : > { %2171 = vmatmul.msk.f32.gmra.mxu3 %vm656_vm5, %v3140_v54  ;;  %2189 = vmatmul.msk.f32.gmra.mxu0 %vm656_vm5, %v3150_v28 }
 0x301   : > { %v3307_v47 = vpop.f32.mrf.mxu3 }
 0x305   : > { %2150 = vmatmul.msk.f32.gmra.mxu2 %vm656_vm5, %v1594_v11 }
 0x306   : > { %2172 = vmatmul.msk.f32.gmra.mxu3 %vm656_vm5, %v3150_v28  ;;  %2190 = vmatmul.msk.f32.gmra.mxu0 %vm656_vm5, %v3165_v24 }
 0x309   : > { %v3314_v35 = vpop.f32.mrf.mxu3 }
 0x30d   : > { %2151 = vmatmul.msk.f32.gmra.mxu2 %vm656_vm5, %v1597_v21 }
 0x30e   : > { %2173 = vmatmul.msk.f32.gmra.mxu3 %vm656_vm5, %v3165_v24  ;;  %2191 = vmatmul.msk.f32.gmra.mxu0 %vm656_vm5, %v3184_v4  ;;  %v1306_v24 = vpop.permute.xlu0 %1305 }
 0x30f   : > { %v1521_v55 = vsel %vm601_vm3, %v1199_v50, %v1306_v24 }
 0x310   : > { %v1551_v60 = vsel %vm626_vm4, %v1521_v55, %v1456_v0 }
 0x311   : > { %v3321_v48 = vpop.f32.mrf.mxu3  ;;  %v1746_v61 = vrot.slane %v1551_v60, 7 }
 0x316   : > { %2174 = vmatmul.msk.f32.gmra.mxu3 %vm656_vm5, %v3184_v4  ;;  %2192 = vmatmul.msk.f32.gmra.mxu0 %vm656_vm5, %v3200_v7 }
 0x319   : > { %v3327_v54 = vpop.f32.mrf.mxu3 }
 0x31e   : > { %2175 = vmatmul.msk.f32.gmra.mxu3 %vm656_vm5, %v3200_v7  ;;  %2193 = vmatmul.msk.f32.gmra.mxu0 %vm656_vm5, %v3216_v19  ;;  %v1458_v7 = vpop.permute.xlu0 %1457 }
 0x321   : > { %v3333_v28 = vpop.f32.mrf.mxu3 }
 0x326   : > { %2176 = vmatmul.msk.f32.gmra.mxu3 %vm656_vm5, %v3216_v19  ;;  %2194 = vmatmul.msk.f32.gmra.mxu0 %vm656_vm5, %v3232_v8  ;;  %v1522_v19 = vsel %vm601_vm3, %v3152_v3, %v1308_v59  ;;  %v1312_v1 = vpop.permute.xlu0 %1311  ;;  %v1523_v3 = vsel %vm601_vm3, %v3161_v56, %v1310_v38 }
 0x327   : > { %v1552_v32 = vsel %vm626_vm4, %v1522_v19, %v1458_v7  ;;  %v1524_v63 = vsel %vm601_vm3, %v1203_v57, %v1312_v1  ;;  %v2202_v7 = vld [vmem:[%s2383_s9 + $0x39] sm:$0xff]  ;;  %v1732_v19 = vadd.f32 %v3307_v47, %v3388_v33  ;;  %v2206_v1 = vld [vmem:[%s2383_s9 + $0x69] sm:$0xff]  ;;  %v1733_v47 = vadd.f32 %v3314_v35, %v3388_v33 }
 0x328   : > { %v1747_v51 = vrot.slane %v1552_v32, 7 }
 0x329   : > { %v3339_v4 = vpop.f32.mrf.mxu3 }
 0x32a   : > { %v1748_v30 = vsel %vm1584_vm9, %v1746_v61, %v1747_v51 }
 0x32e   : > { %2177 = vmatmul.msk.f32.gmra.mxu3 %vm656_vm5, %v3232_v8  ;;  %2195 = vmatmul.msk.f32.gmra.mxu0 %vm656_vm5, %v3246_v43  ;;  %v1460_v8 = vpop.permute.xlu2 %1459  ;;  %v1464_v16 = vpop.permute.xlu0 %1463 }
 0x32f   : > { %v1553_v10 = vsel %vm626_vm4, %v1523_v3, %v1460_v8  ;;  %v2203_v3 = vld [vmem:[%s2383_s9 + $0x49] sm:$0xff] }
 0x330   : > { %v1749_v62 = vrot.slane %v1553_v10, 7 }
 0x331   : > { %v3345_v53 = vpop.f32.mrf.mxu3 }
 0x332   : > { %v1750_v22 = vsel %vm1584_vm9, %v1747_v51, %v1749_v62 }
 0x336   : > { %2178 = vmatmul.msk.f32.gmra.mxu3 %vm656_vm5, %v3246_v43  ;;  %2196 = vmatmul.msk.f32.gmra.mxu0 %vm656_vm5, %v3255_v2  ;;  %v1314_v43 = vpop.permute.xlu1 %1313  ;;  %v1462_v20 = vpop.permute.xlu2 %1461 }
 0x337   : > { %v1525_v56 = vsel %vm601_vm3, %v3186_v42, %v1314_v43  ;;  %v1554_v49 = vsel %vm626_vm4, %v1524_v63, %v1462_v20 }
 0x338   : > { %v1845_v29 = vrot.slane %v1554_v49, 7  ;;  %v2207_v49 = vld [vmem:[%s2383_s9 + $0x79] sm:$0xff] }
 0x339   : > { %v3356_v27 = vpop.f32.mrf.mxu3 }
 0x33e   : > { %2179 = vmatmul.msk.f32.gmra.mxu3 %vm656_vm5, %v3255_v2  ;;  %2197 = vmatmul.msk.f32.gmra.mxu0 %vm656_vm5, %v1748_v30  ;;  %v1555_v2 = vsel %vm626_vm4, %v1525_v56, %v1464_v16  ;;  %v1316_v31 = vpop.permute.xlu1 %1315  ;;  %v1466_v42 = vpop.permute.xlu2 %1465 }
 0x33f   : > { %v1846_v17 = vrot.slane %v1555_v2, 7  ;;  %v1526_v18 = vsel %vm601_vm3, %v3196_v5, %v1316_v31  ;;  %v2204_v2 = vld [vmem:[%s2383_s9 + $0x51] sm:$0xff] }
 0x340   : > { %v1556_v21 = vsel %vm626_vm4, %v1526_v18, %v1466_v42  ;;  %v1734_v18 = vadd.f32 %v3321_v48, %v3388_v33 }
 0x341   : > { %v3365_v12 = vpop.f32.mrf.mxu3  ;;  %v1847_v11 = vsel %vm1584_vm9, %v1845_v29, %v1846_v17  ;;  %v1848_v46 = vrot.slane %v1556_v21, 7 }
 0x343   : > { %v1849_v25 = vsel %vm1584_vm9, %v1846_v17, %v1848_v46 }
 0x346   : > { %2180 = vmatmul.msk.f32.gmra.mxu3 %vm656_vm5, %v1748_v30  ;;  %2198 = vmatmul.msk.f32.gmra.mxu0 %vm656_vm5, %v1750_v22 }
 0x349   : > { %v3375_v52 = vpop.f32.mrf.mxu3 }
 0x34e   : > { %2181 = vmatmul.msk.f32.gmra.mxu3 %vm656_vm5, %v1750_v22  ;;  %2199 = vmatmul.msk.f32.gmra.mxu0 %vm656_vm5, %v1847_v11 }
 0x351   : > { %v3383_v37 = vpop.f32.mrf.mxu3 }
 0x356   : > { %2200 = vmatmul.msk.f32.gmra.mxu0 %vm656_vm5, %v1849_v25 }
 0x359   : > { %v1778_v39 = vpop.f32.mrf.mxu3 }
 0x35b   : > { %v1877_v5 = vpop.f32.mrf.mxu0 }
 0x361   : > { %v1781_v58 = vpop.f32.mrf.mxu3 }
 0x363   : > { %v1880_v6 = vpop.f32.mrf.mxu0 }
 0x369   : > { %v1784_v23 = vpop.f32.mrf.mxu3 }
 0x36b   : > { %v1883_v14 = vpop.f32.mrf.mxu0 }
 0x370   : > { %v1679_v41 = vpop.f32.mrf.mxu2 }
 0x371   : > { %v1727_v34 = vadd.f32 %v1679_v41, %v3388_v33  ;;  %v1787_v15 = vpop.f32.mrf.mxu3  ;;  %v1735_v41 = vadd.f32 %v3327_v54, %v3388_v33 }
 0x373   : > { %v1826_v26 = vadd.f32 %v1778_v39, %v1727_v34  ;;  %v1886_v36 = vpop.f32.mrf.mxu0 }
 0x375   : > { %v1925_v45 = vadd.f32 %v1877_v5, %v1826_v26  ;;  %v2208_v5 = vld [vmem:[%s2383_s9 + $0x81] sm:$0xff] }
 0x377   : > { %v1958_v9 = vadd.f32 %v2201_v13, %v1925_v45 }
 0x378   : > { %v1682_v44 = vpop.f32.mrf.mxu2 }
 0x379   : > { %1974 = vst.msk [vmem:[%s2378_s6] sm:$0xff] %vm601_vm3, %v1958_v9  ;;  %v1728_v24 = vadd.f32 %v1682_v44, %v3388_v33  ;;  %v1790_v59 = vpop.f32.mrf.mxu3  ;;  %v1736_v9 = vadd.f32 %v3333_v28, %v3388_v33  ;;  %v2211_v28 = vld [vmem:[%s2383_s9 + $0xa9] sm:$0xff] }
 0x37b   : > { %v1827_v40 = vadd.f32 %v1781_v58, %v1728_v24  ;;  %v1889_v0 = vpop.f32.mrf.mxu0  ;;  %v2205_v58 = vld [vmem:[%s2383_s9 + $0x61] sm:$0xff] }
 0x37d   : > { %v1926_v50 = vadd.f32 %v1880_v6, %v1827_v40 }
 0x37f   : > { %v1959_v55 = vadd.f32 %v2202_v7, %v1926_v50  ;;  %v1737_v7 = vadd.f32 %v3339_v4, %v3388_v33  ;;  %v2212_v4 = vld [vmem:[%s2383_s9 + $0xb1] sm:$0xff] }
 0x380   : > { %v1685_v38 = vpop.f32.mrf.mxu2 }
 0x381   : > { %1975 = vst.msk [vmem:[%s2378_s6 + $0x8] sm:$0xff] %vm601_vm3, %v1959_v55  ;;  %v1729_v60 = vadd.f32 %v1685_v38, %v3388_v33  ;;  %v1793_v32 = vpop.f32.mrf.mxu3 }
 0x382   : > { %v1831_v8 = vadd.f32 %v1793_v32, %v1732_v19  ;;  %v1738_v32 = vadd.f32 %v3345_v53, %v3388_v33  ;;  %v2213_v53 = vld [vmem:[%s2383_s9 + $0xc1] sm:$0xff] }
 0x383   : > { %v1828_v61 = vadd.f32 %v1784_v23, %v1729_v60  ;;  %v1892_v51 = vpop.f32.mrf.mxu0 }
 0x384   : > { %v1930_v30 = vadd.f32 %v1892_v51, %v1831_v8 }
 0x385   : > { %v1927_v10 = vadd.f32 %v1883_v14, %v1828_v61 }
 0x386   : > { %v1963_v43 = vadd.f32 %v2206_v1, %v1930_v30  ;;  %v1739_v30 = vadd.f32 %v3356_v27, %v3388_v33  ;;  %v2214_v27 = vld [vmem:[%s2383_s9 + $0xc9] sm:$0xff] }
 0x387   : > { %v1960_v57 = vadd.f32 %v2203_v3, %v1927_v10 }
 0x388   : > { %1979 = vst.msk [vmem:[%s2378_s6 + $0x28] sm:$0xff] %vm601_vm3, %v1963_v43  ;;  %v1688_v62 = vpop.f32.mrf.mxu2 }
 0x389   : > { %1976 = vst.msk [vmem:[%s2378_s6 + $0x10] sm:$0xff] %vm601_vm3, %v1960_v57  ;;  %v1730_v20 = vadd.f32 %v1688_v62, %v3388_v33  ;;  %v1796_v63 = vpop.f32.mrf.mxu3 }
 0x38a   : > { %v1832_v56 = vadd.f32 %v1796_v63, %v1733_v47 }
 0x38b   : > { %v1829_v16 = vadd.f32 %v1787_v15, %v1730_v20  ;;  %v1895_v22 = vpop.f32.mrf.mxu0  ;;  %v1740_v20 = vadd.f32 %v3365_v12, %v3388_v33  ;;  %v2215_v12 = vld [vmem:[%s2383_s9 + $0xd9] sm:$0xff] }
 0x38c   : > { %v1931_v31 = vadd.f32 %v1895_v22, %v1832_v56 }
 0x38d   : > { %v1928_v29 = vadd.f32 %v1886_v36, %v1829_v16  ;;  %v2209_v36 = vld [vmem:[%s2383_s9 + $0x91] sm:$0xff] }
 0x38e   : > { %v1964_v35 = vadd.f32 %v2207_v49, %v1931_v31 }
 0x38f   : > { %v1961_v17 = vadd.f32 %v2204_v2, %v1928_v29  ;;  %v1741_v2 = vadd.f32 %v3375_v52, %v3388_v33 }
 0x390   : > { %1980 = vst.msk [vmem:[%s2378_s6 + $0x30] sm:$0xff] %vm601_vm3, %v1964_v35  ;;  %v1691_v42 = vpop.f32.mrf.mxu2 }
 0x391   : > { %1977 = vst.msk [vmem:[%s2378_s6 + $0x18] sm:$0xff] %vm601_vm3, %v1961_v17  ;;  %v1731_v11 = vadd.f32 %v1691_v42, %v3388_v33  ;;  %v1799_v21 = vpop.f32.mrf.mxu3  ;;  %v1742_v42 = vadd.f32 %v3383_v37, %v3388_v33 }
 0x392   : > { %v1833_v46 = vadd.f32 %v1799_v21, %v1734_v18 }
 0x393   : > { %v1830_v25 = vadd.f32 %v1790_v59, %v1731_v11  ;;  %v1898_v39 = vpop.f32.mrf.mxu0  ;;  %v2210_v59 = vld [vmem:[%s2383_s9 + $0x99] sm:$0xff] }
 0x394   : > { %v1932_v6 = vadd.f32 %v1898_v39, %v1833_v46 }
 0x395   : > { %v1929_v23 = vadd.f32 %v1889_v0, %v1830_v25  ;;  %v2216_v25 = vld [vmem:[%s2383_s9 + $0xe1] sm:$0xff] }
 0x396   : > { %v1965_v48 = vadd.f32 %v2208_v5, %v1932_v6 }
 0x397   : > { %v1962_v14 = vadd.f32 %v2205_v58, %v1929_v23 }
 0x398   : > { %1981 = vst.msk [vmem:[%s2378_s6 + $0x38] sm:$0xff] %vm601_vm3, %v1965_v48 }
 0x399   : > { %1978 = vst.msk [vmem:[%s2378_s6 + $0x20] sm:$0xff] %vm601_vm3, %v1962_v14  ;;  %v1802_v34 = vpop.f32.mrf.mxu3 }
 0x39a   : > { %v1834_v15 = vadd.f32 %v1802_v34, %v1735_v41 }
 0x39b   : > { %v1901_v26 = vpop.f32.mrf.mxu0 }
 0x39c   : > { %v1933_v13 = vadd.f32 %v1901_v26, %v1834_v15 }
 0x39e   : > { %v1966_v45 = vadd.f32 %v2209_v36, %v1933_v13 }
 0x3a0   : > { %1982 = vst.msk [vmem:[%s2378_s6 + $0x40] sm:$0xff] %vm601_vm3, %v1966_v45 }
 0x3a1   : > { %v1805_v44 = vpop.f32.mrf.mxu3 }
 0x3a2   : > { %v1835_v54 = vadd.f32 %v1805_v44, %v1736_v9 }
 0x3a3   : > { %v1904_v24 = vpop.f32.mrf.mxu0 }
 0x3a4   : > { %v1934_v40 = vadd.f32 %v1904_v24, %v1835_v54 }
 0x3a6   : > { %v1967_v0 = vadd.f32 %v2210_v59, %v1934_v40 }
 0x3a8   : > { %1983 = vst.msk [vmem:[%s2378_s6 + $0x48] sm:$0xff] %vm601_vm3, %v1967_v0 }
 0x3a9   : > { %v1808_v50 = vpop.f32.mrf.mxu3 }
 0x3aa   : > { %v1836_v55 = vadd.f32 %v1808_v50, %v1737_v7 }
 0x3ab   : > { %v1907_v19 = vpop.f32.mrf.mxu0 }
 0x3ac   : > { %v1935_v38 = vadd.f32 %v1907_v19, %v1836_v55 }
 0x3ae   : > { %v1968_v60 = vadd.f32 %v2211_v28, %v1935_v38 }
 0x3b0   : > { %1984 = vst.msk [vmem:[%s2378_s6 + $0x50] sm:$0xff] %vm601_vm3, %v1968_v60 }
 0x3b1   : > { %v1811_v8 = vpop.f32.mrf.mxu3 }
 0x3b2   : > { %v1837_v61 = vadd.f32 %v1811_v8, %v1738_v32 }
 0x3b3   : > { %v1910_v51 = vpop.f32.mrf.mxu0 }
 0x3b4   : > { %v1936_v1 = vadd.f32 %v1910_v51, %v1837_v61 }
 0x3b6   : > { %v1969_v3 = vadd.f32 %v2212_v4, %v1936_v1 }
 0x3b8   : > { %1985 = vst.msk [vmem:[%s2378_s6 + $0x58] sm:$0xff] %vm601_vm3, %v1969_v3 }
 0x3b9   : > { %v1814_v10 = vpop.f32.mrf.mxu3 }
 0x3ba   : > { %v1838_v43 = vadd.f32 %v1814_v10, %v1739_v30 }
 0x3bb   : > { %v1913_v57 = vpop.f32.mrf.mxu0 }
 0x3bc   : > { %v1937_v47 = vadd.f32 %v1913_v57, %v1838_v43 }
 0x3be   : > { %v1970_v62 = vadd.f32 %v2213_v53, %v1937_v47 }
 0x3c0   : > { %1986 = vst.msk [vmem:[%s2378_s6 + $0x60] sm:$0xff] %vm601_vm3, %v1970_v62 }
 0x3c1   : > { %v1817_v63 = vpop.f32.mrf.mxu3 }
 0x3c2   : > { %v1839_v56 = vadd.f32 %v1817_v63, %v1740_v20 }
 0x3c3   : > { %v1916_v16 = vpop.f32.mrf.mxu0 }
 0x3c4   : > { %v1938_v22 = vadd.f32 %v1916_v16, %v1839_v56 }
 0x3c6   : > { %v1971_v49 = vadd.f32 %v2214_v27, %v1938_v22 }
 0x3c8   : > { %1987 = vst.msk [vmem:[%s2378_s6 + $0x68] sm:$0xff] %vm601_vm3, %v1971_v49 }
 0x3c9   : > { %v1820_v31 = vpop.f32.mrf.mxu3 }
 0x3ca   : > { %v1840_v29 = vadd.f32 %v1820_v31, %v1741_v2 }
 0x3cb   : > { %v1919_v35 = vpop.f32.mrf.mxu0 }
 0x3cc   : > { %v1939_v17 = vadd.f32 %v1919_v35, %v1840_v29 }
 0x3ce   : > { %v1972_v18 = vadd.f32 %v2215_v12, %v1939_v17 }
 0x3d0   : > { %1988 = vst.msk [vmem:[%s2378_s6 + $0x70] sm:$0xff] %vm601_vm3, %v1972_v18 }
 0x3d1   : > { %v1823_v11 = vpop.f32.mrf.mxu3 }
 0x3d2   : > { %v1841_v21 = vadd.f32 %v1823_v11, %v1742_v42 }
 0x3d3   : > { %v1922_v46 = vpop.f32.mrf.mxu0 }
 0x3d4   : > { %v1940_v39 = vadd.f32 %v1922_v46, %v1841_v21 }
 0x3d6   : > { %v1973_v52 = vadd.f32 %v2216_v25, %v1940_v39 }
 0x3d8   : > { %1989 = vst.msk [vmem:[%s2378_s6 + $0x78] sm:$0xff] %vm601_vm3, %v1973_v52 }
 0x3d9 PF: > { %s15_s22 = sadd.s32 1, %s2308_s22   ;;  %s3486_s18 = smov %s2300_s20 }
 0x3da   : > { %p12_p8 = scmp.ge.s32.totalorder %s15_s22, 6   ;;  %s3487_s19 = smov %s2304_s21 }
 0x3db   : > { %s3488_s20 = smov %s3491_s23  ;;  %s3489_s21 = smov %s3495_s24 }
 0x3dc   :  { %14 = sbr.rel (!%p12_p8) target bundleno = 3 (0x3), region = 86 }

</bundles_post_ra>
